<compile_context>
chip_gen: v5e
topology: v5e:2x2
jax: 0.10.0
libtpu: 0.0.40
codegen_flags: <defaults>
</compile_context>

<pallas_src>
import numpy as np

import jax
import jax.numpy as jnp
from jax.experimental import pallas as pl
from jax.experimental.pallas import tpu as pltpu


def _round_up(v, m):
    return (v + m - 1) // m * m


def _pad_geometry(H, W):
    """Lane layout of the flattened zero-padded scratch."""
    HW = H * W
    D0 = _round_up(W + 1, 128)                  # lane offset of pixel (0, 0); vreg-aligned
    PADW = D0 + HW + _round_up(W + 1, 128)      # >= W+1 zero lanes on both sides
    return HW, D0, PADW


def _is_multi_tensorcore_chip():
    """v7x has 2 TensorCores per chip; v5e/v6e have 1."""
    try:
        kind = jax.devices()[0].device_kind.lower()
    except Exception:
        return False
    return ("v7" in kind) or ("tpu7" in kind)


def _make_resblock_kernel(H, W, Cin, P, CP, PP, NB):
    """CP/PP: conv1/conv2 input channels padded to the 8-sublane tile.
    NB: images processed per grid step (laid side-by-side along lanes)."""
    HW, D0, PADW = _pad_geometry(H, W)

    def kernel(x_ref, w13_ref, b1_ref, w2_ref, b2_ref, b3_ref, mask_ref,
               o_ref, xpad_ref, ypad_ref, col_ref):
        # x_ref : (NB, Cin, HW)            o_ref : (NB, P, HW)
        # w13_ref: (2P, 9*CP) [conv1 | conv3(1x1)]     w2_ref: (P, 9*PP)
        # b*_ref: (P, 1)                   mask_ref: (2, HW) f32 edge masks
        # xpad_ref: (CP, PADW)  ypad_ref: (PP, PADW)  col_ref: (9*max(CP,PP), NB*HW)

        def im2col(pad_ref, rows, m_l, m_r, col_off):
            # Write the 9 shifted (rows, HW) windows of pad_ref into
            # col_ref[:9*rows, col_off:col_off+HW].  Vertical out-of-image taps
            # read the zeroed border lanes of pad_ref; horizontal out-of-image
            # taps are killed by the pre-broadcast edge masks (jnp.where).
            for ky in range(3):
                for kx in range(3):
                    start = D0 + (ky - 1) * W + (kx - 1)
                    win = pad_ref[:, start:start + HW]        # (rows, HW)
                    if kx == 0:                               # left tap: zero w == 0
                        win = jnp.where(m_l, win, 0.0)
                    elif kx == 2:                             # right tap: zero w == W-1
                        win = jnp.where(m_r, win, 0.0)
                    t = ky * 3 + kx
                    col_ref[t * rows:(t + 1) * rows, col_off:col_off + HW] = win

        # Edge masks: broadcast + compare ONCE per conv (not inside the tap loop).
        m_l1 = jnp.broadcast_to(mask_ref[0:1, :], (CP, HW)) > 0.0
        m_r1 = jnp.broadcast_to(mask_ref[1:2, :], (CP, HW)) > 0.0

        # ---- stage x: zero the whole lane-aligned padded scratch (a handful of
        # full vregs, kept per-step for core-sharded-grid safety), then per-image
        # interior write + im2col. --------------------------------------------
        xpad_ref[...] = jnp.zeros_like(xpad_ref)
        for n in range(NB):
            xpad_ref[:Cin, D0:D0 + HW] = x_ref[n]
            im2col(xpad_ref, CP, m_l1, m_r1, n * HW)

        # ---- conv1 (3x3) + conv3 (1x1 shortcut): ONE MXU matmul --------------
        big = jnp.dot(w13_ref[...], col_ref[:9 * CP, :],
                      preferred_element_type=jnp.float32)        # (2P, NB*HW)
        y1 = jnp.maximum(big[:P, :] + b1_ref[...], 0.0)          # relu(conv1(x)+b1)
        shortcut = big[P:2 * P, :] + b3_ref[...]                 # conv3(x)+b3

        # ---- conv2 (3x3): same scheme, ONE matmul ----------------------------
        if PP == CP:
            m_l2, m_r2 = m_l1, m_r1
        else:
            m_l2 = jnp.broadcast_to(mask_ref[0:1, :], (PP, HW)) > 0.0
            m_r2 = jnp.broadcast_to(mask_ref[1:2, :], (PP, HW)) > 0.0
        ypad_ref[...] = jnp.zeros_like(ypad_ref)
        for n in range(NB):
            ypad_ref[:P, D0:D0 + HW] = y1[:, n * HW:(n + 1) * HW]
            im2col(ypad_ref, PP, m_l2, m_r2, n * HW)
        acc2 = jnp.dot(w2_ref[...], col_ref[:9 * PP, :],
                       preferred_element_type=jnp.float32)       # (P, NB*HW)
        y2 = jnp.maximum(acc2 + b2_ref[...], 0.0)

        # ---- residual add + relu; lane-dense, vreg-aligned stores ------------
        out = jnp.maximum(shortcut + y2, 0.0).astype(o_ref.dtype)
        for n in range(NB):
            o_ref[n] = out[:, n * HW:(n + 1) * HW]

    return kernel


def pack_resblock_params(w1, b1, w2, b2, w3, b3):
    """One-time weight/bias packing — call once, outside the hot path.

    w1: (P, Cin, 3, 3)  b1: (P,)   conv1
    w2: (P, P, 3, 3)    b2: (P,)   conv2
    w3: (P, Cin)        b3: (P,)   conv3 (1x1)
    """
    P, Cin = w1.shape[0], w1.shape[1]
    CP = _round_up(Cin, 8)
    PP = _round_up(P, 8)
    # conv1 -> (P, 9*CP): column index = (ky*3+kx)*CP + cin (padded cin cols = 0).
    w1p = jnp.pad(w1, ((0, 0), (0, CP - Cin), (0, 0), (0, 0)))
    w1m = jnp.transpose(w1p, (0, 2, 3, 1)).reshape(P, 9 * CP)
    # conv3 (1x1) folded into the same matmul: only centre-tap columns non-zero.
    w3m = (jnp.zeros((P, 3, 3, CP), w3.dtype).at[:, 1, 1, :Cin].set(w3)
           .reshape(P, 9 * CP))
    w13 = jnp.concatenate([w1m, w3m], axis=0)                    # (2P, 9*CP)
    # conv2 -> (P, 9*PP)
    w2p = jnp.pad(w2, ((0, 0), (0, PP - P), (0, 0), (0, 0)))
    w2m = jnp.transpose(w2p, (0, 2, 3, 1)).reshape(P, 9 * PP)
    # TODO(synk): at real denoiser channel counts cast w13/w2m (and the in-kernel
    # col scratch) to bf16 on v6e/v7x, keeping f32 accumulation and f32 epilogue
    # (v5e VPU/EUP have no bf16, so keep all elementwise work in f32 there).
    return dict(w13=w13, b1=b1.reshape(P, 1), w2=w2m,
                b2=b2.reshape(P, 1), b3=b3.reshape(P, 1))


def res_block_forward(x_nchw, params):
    """Fused resBlock forward.  x_nchw: (N, Cin, H, W) f32 -> (N, P, H, W) f32."""
    N, Cin, H, W = x_nchw.shape
    w13, w2m = params["w13"], params["w2"]
    P = w13.shape[0] // 2
    CP = w13.shape[1] // 9
    PP = w2m.shape[1] // 9
    HW, _, PADW = _pad_geometry(H, W)

    # Free relayout: channels stay in sublanes, flattened H*W goes to lanes.
    x = x_nchw.reshape(N, Cin, HW)

    # Horizontal-edge masks for the +-1 column taps (compile-time constants).
    wcol = np.arange(HW, dtype=np.int32) % W
    masks = jnp.asarray(np.stack([wcol != 0, wcol != W - 1]).astype(np.float32))

    # v7x (2 TensorCores): keep batch on the grid, core-sharded.  Single-TC
    # v5e/v6e: the kernel is grid-step-overhead bound, so collapse the batch
    # into one grid step with images side-by-side along lanes.
    per_image_grid = _is_multi_tensorcore_chip() and N > 1
    NB = 1 if per_image_grid else N
    steps = N // NB
    if per_image_grid:
        dim_sem = (getattr(pltpu, "CORE_PARALLEL", "parallel"),)
    else:
        dim_sem = ("arbitrary",)

    kernel = _make_resblock_kernel(H, W, Cin, P, CP, PP, NB)
    CR = 9 * max(CP, PP)

    out = pl.pallas_call(
        kernel,
        out_shape=jax.ShapeDtypeStruct((N, P, HW), jnp.float32),
        grid_spec=pltpu.PrefetchScalarGridSpec(
            num_scalar_prefetch=0,
            grid=(steps,),
            in_specs=[
                pl.BlockSpec((NB, Cin, HW), lambda i: (i, 0, 0)),   # x (lane-dense)
                pl.BlockSpec((2 * P, 9 * CP), lambda i: (0, 0)),    # packed conv1+conv3
                pl.BlockSpec((P, 1), lambda i: (0, 0)),             # b1
                pl.BlockSpec((P, 9 * PP), lambda i: (0, 0)),        # conv2
                pl.BlockSpec((P, 1), lambda i: (0, 0)),             # b2
                pl.BlockSpec((P, 1), lambda i: (0, 0)),             # b3
                pl.BlockSpec((2, HW), lambda i: (0, 0)),            # edge masks
            ],
            out_specs=pl.BlockSpec((NB, P, HW), lambda i: (i, 0, 0)),
            scratch_shapes=[
                pltpu.VMEM((CP, PADW), jnp.float32),      # zero-padded x (lane-aligned)
                pltpu.VMEM((PP, PADW), jnp.float32),      # zero-padded y1
                pltpu.VMEM((CR, NB * HW), jnp.float32),   # im2col patches (shared)
            ],
        ),
        # TODO(synk): at real denoiser resolutions tile H; size tiles against
        # v7x's 64 MiB VMEM (~half the v5e/v6e tile) and raise vmem_limit_bytes
        # via pltpu.CompilerParams(...) above the 16/32 MiB scoped defaults.
        compiler_params=pltpu.CompilerParams(dimension_semantics=dim_sem),
    )(x, w13, params["b1"], w2m, params["b2"], params["b3"], masks)

    # Free relayout back to NCHW.
    return out.reshape(N, P, H, W)


def ref_res_block(x, w1, b1, w2, b2, w3, b3):
    """Plain-JAX reference (correctness check only)."""
    dn = ("NCHW", "OIHW", "NCHW")
    y = jax.lax.conv_general_dilated(x, w1, (1, 1), "SAME", dimension_numbers=dn)
    y = jnp.maximum(y + b1.reshape(1, -1, 1, 1), 0.0)
    y = jax.lax.conv_general_dilated(y, w2, (1, 1), "SAME", dimension_numbers=dn)
    y = jnp.maximum(y + b2.reshape(1, -1, 1, 1), 0.0)
    sc = jnp.einsum("pc,nchw->nphw", w3, x) + b3.reshape(1, -1, 1, 1)
    return jnp.maximum(sc + y, 0.0)


if __name__ == "__main__":
    # resBlock(in_planes=4, planes=8) on a (2, 4, 16, 16) input.
    N, Cin, P, H, W = 2, 4, 8, 16, 16
    keys = jax.random.split(jax.random.PRNGKey(0), 7)

    x = jax.random.normal(keys[0], (N, Cin, H, W), jnp.float32)
    w1 = jax.random.normal(keys[1], (P, Cin, 3, 3), jnp.float32) * 0.1   # conv1 (OIHW)
    b1 = jax.random.normal(keys[2], (P,), jnp.float32) * 0.1
    w2 = jax.random.normal(keys[3], (P, P, 3, 3), jnp.float32) * 0.1     # conv2 (OIHW)
    b2 = jax.random.normal(keys[4], (P,), jnp.float32) * 0.1
    w3 = jax.random.normal(keys[5], (P, Cin), jnp.float32) * 0.1         # conv3 (1x1)
    b3 = jax.random.normal(keys[6], (P,), jnp.float32) * 0.1

    # Pack weights ONCE (outside the hot path), then run the fused forward.
    params = pack_resblock_params(w1, b1, w2, b2, w3, b3)
    params = jax.tree_util.tree_map(jnp.asarray, params)
    fwd = jax.jit(res_block_forward)

    out = fwd(x, params)
    jax.block_until_ready(out)
    assert out.shape == (N, P, H, W), out.shape

    ref = ref_res_block(x, w1, b1, w2, b2, w3, b3)
    max_err = float(jnp.max(jnp.abs(out - ref)))
    assert jnp.allclose(out, ref, atol=1e-4, rtol=1e-4), max_err

    print("KERNEL_OK")
</pallas_src>

<mosaic_0001>
module attributes {stable_mosaic.version = 11 : i64} {
  func.func @kernel(%arg0: i32, %arg1: memref<2x4x256xf32, #tpu.memory_space<vmem>>, %arg2: memref<16x72xf32, #tpu.memory_space<vmem>>, %arg3: memref<8x1xf32, #tpu.memory_space<vmem>>, %arg4: memref<8x72xf32, #tpu.memory_space<vmem>>, %arg5: memref<8x1xf32, #tpu.memory_space<vmem>>, %arg6: memref<8x1xf32, #tpu.memory_space<vmem>>, %arg7: memref<2x256xf32, #tpu.memory_space<vmem>>, %arg8: memref<2x8x256xf32, #tpu.memory_space<vmem>>, %arg9: memref<8x512xf32, #tpu.memory_space<vmem>>, %arg10: memref<8x512xf32, #tpu.memory_space<vmem>>, %arg11: memref<72x512xf32, #tpu.memory_space<vmem>>) attributes {dimension_semantics = [#tpu.dimension_semantics<arbitrary>], iteration_bounds = array<i64: 1>, scalar_prefetch = 0 : i64, scratch_operands = 3 : i64, tpu.core_type = #tpu.core_type<tc>, window_params = [{transform_indices = @transform_0, window_bounds = array<i64: 2, 4, 256>}, {pipeline_mode = #tpu.pipeline_mode<synchronous>, transform_indices = @transform_1, window_bounds = array<i64: 16, 72>}, {pipeline_mode = #tpu.pipeline_mode<synchronous>, transform_indices = @transform_2, window_bounds = array<i64: 8, 1>}, {pipeline_mode = #tpu.pipeline_mode<synchronous>, transform_indices = @transform_3, window_bounds = array<i64: 8, 72>}, {pipeline_mode = #tpu.pipeline_mode<synchronous>, transform_indices = @transform_4, window_bounds = array<i64: 8, 1>}, {pipeline_mode = #tpu.pipeline_mode<synchronous>, transform_indices = @transform_5, window_bounds = array<i64: 8, 1>}, {pipeline_mode = #tpu.pipeline_mode<synchronous>, transform_indices = @transform_6, window_bounds = array<i64: 2, 256>}, {transform_indices = @transform_7, window_bounds = array<i64: 2, 8, 256>}]} {
    %c0 = arith.constant 0 : index
    %c0_0 = arith.constant 0 : index
    %0 = vector.load %arg7[%c0, %c0_0] : memref<2x256xf32, #tpu.memory_space<vmem>>, vector<1x256xf32>
    %1 = vector.shape_cast %0 : vector<1x256xf32> to vector<1x256xf32>
    %2 = vector.broadcast %1 : vector<1x256xf32> to vector<8x256xf32>
    %cst = arith.constant 0.000000e+00 : f32
    %3 = vector.broadcast %cst : f32 to vector<8x256xf32>
    %4 = arith.cmpf ogt, %2, %3 : vector<8x256xf32>
    %c1 = arith.constant 1 : index
    %c0_1 = arith.constant 0 : index
    %5 = vector.load %arg7[%c1, %c0_1] : memref<2x256xf32, #tpu.memory_space<vmem>>, vector<1x256xf32>
    %6 = vector.shape_cast %5 : vector<1x256xf32> to vector<1x256xf32>
    %7 = vector.broadcast %6 : vector<1x256xf32> to vector<8x256xf32>
    %cst_2 = arith.constant 0.000000e+00 : f32
    %8 = vector.broadcast %cst_2 : f32 to vector<8x256xf32>
    %9 = arith.cmpf ogt, %7, %8 : vector<8x256xf32>
    %cst_3 = arith.constant 0.000000e+00 : f32
    %10 = vector.broadcast %cst_3 : f32 to vector<8x512xf32>
    %c0_4 = arith.constant 0 : index
    %c0_5 = arith.constant 0 : index
    %11 = vector.load %arg9[%c0_4, %c0_5] : memref<8x512xf32, #tpu.memory_space<vmem>>, vector<8x512xf32>
    tpu.vector_store %arg9[%c0_4, %c0_5], %10 {strides = array<i32>} : memref<8x512xf32, #tpu.memory_space<vmem>>, vector<8x512xf32>,
    %c0_6 = arith.constant 0 : index
    %c0_7 = arith.constant 0 : index
    %c0_8 = arith.constant 0 : index
    %12 = vector.load %arg1[%c0_6, %c0_7, %c0_8] : memref<2x4x256xf32, #tpu.memory_space<vmem>>, vector<1x4x256xf32>
    %13 = vector.shape_cast %12 : vector<1x4x256xf32> to vector<4x256xf32>
    %c0_9 = arith.constant 0 : index
    %c128 = arith.constant 128 : index
    %14 = vector.load %arg9[%c0_9, %c128] : memref<8x512xf32, #tpu.memory_space<vmem>>, vector<4x256xf32>
    tpu.vector_store %arg9[%c0_9, %c128], %13 {strides = array<i32>} : memref<8x512xf32, #tpu.memory_space<vmem>>, vector<4x256xf32>,
    %c0_10 = arith.constant 0 : index
    %c111 = arith.constant 111 : index
    %15 = vector.load %arg9[%c0_10, %c111] : memref<8x512xf32, #tpu.memory_space<vmem>>, vector<8x256xf32>
    %cst_11 = arith.constant 0.000000e+00 : f32
    %16 = vector.broadcast %cst_11 : f32 to vector<8x256xf32>
    %17 = arith.select %4, %15, %16 : vector<8x256xi1>, vector<8x256xf32>
    %c0_12 = arith.constant 0 : index
    %c0_13 = arith.constant 0 : index
    %18 = vector.load %arg11[%c0_12, %c0_13] : memref<72x512xf32, #tpu.memory_space<vmem>>, vector<8x256xf32>
    tpu.vector_store %arg11[%c0_12, %c0_13], %17 {strides = array<i32>} : memref<72x512xf32, #tpu.memory_space<vmem>>, vector<8x256xf32>,
    %c0_14 = arith.constant 0 : index
    %c112 = arith.constant 112 : index
    %19 = vector.load %arg9[%c0_14, %c112] : memref<8x512xf32, #tpu.memory_space<vmem>>, vector<8x256xf32>
    %c8 = arith.constant 8 : index
    %c0_15 = arith.constant 0 : index
    %20 = vector.load %arg11[%c8, %c0_15] : memref<72x512xf32, #tpu.memory_space<vmem>>, vector<8x256xf32>
    tpu.vector_store %arg11[%c8, %c0_15], %19 {strides = array<i32>} : memref<72x512xf32, #tpu.memory_space<vmem>>, vector<8x256xf32>,
    %c0_16 = arith.constant 0 : index
    %c113 = arith.constant 113 : index
    %21 = vector.load %arg9[%c0_16, %c113] : memref<8x512xf32, #tpu.memory_space<vmem>>, vector<8x256xf32>
    %cst_17 = arith.constant 0.000000e+00 : f32
    %22 = vector.broadcast %cst_17 : f32 to vector<8x256xf32>
    %23 = arith.select %9, %21, %22 : vector<8x256xi1>, vector<8x256xf32>
    %c16 = arith.constant 16 : index
    %c0_18 = arith.constant 0 : index
    %24 = vector.load %arg11[%c16, %c0_18] : memref<72x512xf32, #tpu.memory_space<vmem>>, vector<8x256xf32>
    tpu.vector_store %arg11[%c16, %c0_18], %23 {strides = array<i32>} : memref<72x512xf32, #tpu.memory_space<vmem>>, vector<8x256xf32>,
    %c0_19 = arith.constant 0 : index
    %c127 = arith.constant 127 : index
    %25 = vector.load %arg9[%c0_19, %c127] : memref<8x512xf32, #tpu.memory_space<vmem>>, vector<8x256xf32>
    %cst_20 = arith.constant 0.000000e+00 : f32
    %26 = vector.broadcast %cst_20 : f32 to vector<8x256xf32>
    %27 = arith.select %4, %25, %26 : vector<8x256xi1>, vector<8x256xf32>
    %c24 = arith.constant 24 : index
    %c0_21 = arith.constant 0 : index
    %28 = vector.load %arg11[%c24, %c0_21] : memref<72x512xf32, #tpu.memory_space<vmem>>, vector<8x256xf32>
    tpu.vector_store %arg11[%c24, %c0_21], %27 {strides = array<i32>} : memref<72x512xf32, #tpu.memory_space<vmem>>, vector<8x256xf32>,
    %c0_22 = arith.constant 0 : index
    %c128_23 = arith.constant 128 : index
    %29 = vector.load %arg9[%c0_22, %c128_23] : memref<8x512xf32, #tpu.memory_space<vmem>>, vector<8x256xf32>
    %c32 = arith.constant 32 : index
    %c0_24 = arith.constant 0 : index
    %30 = vector.load %arg11[%c32, %c0_24] : memref<72x512xf32, #tpu.memory_space<vmem>>, vector<8x256xf32>
    tpu.vector_store %arg11[%c32, %c0_24], %29 {strides = array<i32>} : memref<72x512xf32, #tpu.memory_space<vmem>>, vector<8x256xf32>,
    %c0_25 = arith.constant 0 : index
    %c129 = arith.constant 129 : index
    %31 = vector.load %arg9[%c0_25, %c129] : memref<8x512xf32, #tpu.memory_space<vmem>>, vector<8x256xf32>
    %cst_26 = arith.constant 0.000000e+00 : f32
    %32 = vector.broadcast %cst_26 : f32 to vector<8x256xf32>
    %33 = arith.select %9, %31, %32 : vector<8x256xi1>, vector<8x256xf32>
    %c40 = arith.constant 40 : index
    %c0_27 = arith.constant 0 : index
    %34 = vector.load %arg11[%c40, %c0_27] : memref<72x512xf32, #tpu.memory_space<vmem>>, vector<8x256xf32>
    tpu.vector_store %arg11[%c40, %c0_27], %33 {strides = array<i32>} : memref<72x512xf32, #tpu.memory_space<vmem>>, vector<8x256xf32>,
    %c0_28 = arith.constant 0 : index
    %c143 = arith.constant 143 : index
    %35 = vector.load %arg9[%c0_28, %c143] : memref<8x512xf32, #tpu.memory_space<vmem>>, vector<8x256xf32>
    %cst_29 = arith.constant 0.000000e+00 : f32
    %36 = vector.broadcast %cst_29 : f32 to vector<8x256xf32>
    %37 = arith.select %4, %35, %36 : vector<8x256xi1>, vector<8x256xf32>
    %c48 = arith.constant 48 : index
    %c0_30 = arith.constant 0 : index
    %38 = vector.load %arg11[%c48, %c0_30] : memref<72x512xf32, #tpu.memory_space<vmem>>, vector<8x256xf32>
    tpu.vector_store %arg11[%c48, %c0_30], %37 {strides = array<i32>} : memref<72x512xf32, #tpu.memory_space<vmem>>, vector<8x256xf32>,
    %c0_31 = arith.constant 0 : index
    %c144 = arith.constant 144 : index
    %39 = vector.load %arg9[%c0_31, %c144] : memref<8x512xf32, #tpu.memory_space<vmem>>, vector<8x256xf32>
    %c56 = arith.constant 56 : index
    %c0_32 = arith.constant 0 : index
    %40 = vector.load %arg11[%c56, %c0_32] : memref<72x512xf32, #tpu.memory_space<vmem>>, vector<8x256xf32>
    tpu.vector_store %arg11[%c56, %c0_32], %39 {strides = array<i32>} : memref<72x512xf32, #tpu.memory_space<vmem>>, vector<8x256xf32>,
    %c0_33 = arith.constant 0 : index
    %c145 = arith.constant 145 : index
    %41 = vector.load %arg9[%c0_33, %c145] : memref<8x512xf32, #tpu.memory_space<vmem>>, vector<8x256xf32>
    %cst_34 = arith.constant 0.000000e+00 : f32
    %42 = vector.broadcast %cst_34 : f32 to vector<8x256xf32>
    %43 = arith.select %9, %41, %42 : vector<8x256xi1>, vector<8x256xf32>
    %c64 = arith.constant 64 : index
    %c0_35 = arith.constant 0 : index
    %44 = vector.load %arg11[%c64, %c0_35] : memref<72x512xf32, #tpu.memory_space<vmem>>, vector<8x256xf32>
    tpu.vector_store %arg11[%c64, %c0_35], %43 {strides = array<i32>} : memref<72x512xf32, #tpu.memory_space<vmem>>, vector<8x256xf32>,
    %c1_36 = arith.constant 1 : index
    %c0_37 = arith.constant 0 : index
    %c0_38 = arith.constant 0 : index
    %45 = vector.load %arg1[%c1_36, %c0_37, %c0_38] : memref<2x4x256xf32, #tpu.memory_space<vmem>>, vector<1x4x256xf32>
    %46 = vector.shape_cast %45 : vector<1x4x256xf32> to vector<4x256xf32>
    %c0_39 = arith.constant 0 : index
    %c128_40 = arith.constant 128 : index
    %47 = vector.load %arg9[%c0_39, %c128_40] : memref<8x512xf32, #tpu.memory_space<vmem>>, vector<4x256xf32>
    tpu.vector_store %arg9[%c0_39, %c128_40], %46 {strides = array<i32>} : memref<8x512xf32, #tpu.memory_space<vmem>>, vector<4x256xf32>,
    %c0_41 = arith.constant 0 : index
    %c111_42 = arith.constant 111 : index
    %48 = vector.load %arg9[%c0_41, %c111_42] : memref<8x512xf32, #tpu.memory_space<vmem>>, vector<8x256xf32>
    %cst_43 = arith.constant 0.000000e+00 : f32
    %49 = vector.broadcast %cst_43 : f32 to vector<8x256xf32>
    %50 = arith.select %4, %48, %49 : vector<8x256xi1>, vector<8x256xf32>
    %c0_44 = arith.constant 0 : index
    %c256 = arith.constant 256 : index
    %51 = vector.load %arg11[%c0_44, %c256] : memref<72x512xf32, #tpu.memory_space<vmem>>, vector<8x256xf32>
    tpu.vector_store %arg11[%c0_44, %c256], %50 {strides = array<i32>} : memref<72x512xf32, #tpu.memory_space<vmem>>, vector<8x256xf32>,
    %c0_45 = arith.constant 0 : index
    %c112_46 = arith.constant 112 : index
    %52 = vector.load %arg9[%c0_45, %c112_46] : memref<8x512xf32, #tpu.memory_space<vmem>>, vector<8x256xf32>
    %c8_47 = arith.constant 8 : index
    %c256_48 = arith.constant 256 : index
    %53 = vector.load %arg11[%c8_47, %c256_48] : memref<72x512xf32, #tpu.memory_space<vmem>>, vector<8x256xf32>
    tpu.vector_store %arg11[%c8_47, %c256_48], %52 {strides = array<i32>} : memref<72x512xf32, #tpu.memory_space<vmem>>, vector<8x256xf32>,
    %c0_49 = arith.constant 0 : index
    %c113_50 = arith.constant 113 : index
    %54 = vector.load %arg9[%c0_49, %c113_50] : memref<8x512xf32, #tpu.memory_space<vmem>>, vector<8x256xf32>
    %cst_51 = arith.constant 0.000000e+00 : f32
    %55 = vector.broadcast %cst_51 : f32 to vector<8x256xf32>
    %56 = arith.select %9, %54, %55 : vector<8x256xi1>, vector<8x256xf32>
    %c16_52 = arith.constant 16 : index
    %c256_53 = arith.constant 256 : index
    %57 = vector.load %arg11[%c16_52, %c256_53] : memref<72x512xf32, #tpu.memory_space<vmem>>, vector<8x256xf32>
    tpu.vector_store %arg11[%c16_52, %c256_53], %56 {strides = array<i32>} : memref<72x512xf32, #tpu.memory_space<vmem>>, vector<8x256xf32>,
    %c0_54 = arith.constant 0 : index
    %c127_55 = arith.constant 127 : index
    %58 = vector.load %arg9[%c0_54, %c127_55] : memref<8x512xf32, #tpu.memory_space<vmem>>, vector<8x256xf32>
    %cst_56 = arith.constant 0.000000e+00 : f32
    %59 = vector.broadcast %cst_56 : f32 to vector<8x256xf32>
    %60 = arith.select %4, %58, %59 : vector<8x256xi1>, vector<8x256xf32>
    %c24_57 = arith.constant 24 : index
    %c256_58 = arith.constant 256 : index
    %61 = vector.load %arg11[%c24_57, %c256_58] : memref<72x512xf32, #tpu.memory_space<vmem>>, vector<8x256xf32>
    tpu.vector_store %arg11[%c24_57, %c256_58], %60 {strides = array<i32>} : memref<72x512xf32, #tpu.memory_space<vmem>>, vector<8x256xf32>,
    %c0_59 = arith.constant 0 : index
    %c128_60 = arith.constant 128 : index
    %62 = vector.load %arg9[%c0_59, %c128_60] : memref<8x512xf32, #tpu.memory_space<vmem>>, vector<8x256xf32>
    %c32_61 = arith.constant 32 : index
    %c256_62 = arith.constant 256 : index
    %63 = vector.load %arg11[%c32_61, %c256_62] : memref<72x512xf32, #tpu.memory_space<vmem>>, vector<8x256xf32>
    tpu.vector_store %arg11[%c32_61, %c256_62], %62 {strides = array<i32>} : memref<72x512xf32, #tpu.memory_space<vmem>>, vector<8x256xf32>,
    %c0_63 = arith.constant 0 : index
    %c129_64 = arith.constant 129 : index
    %64 = vector.load %arg9[%c0_63, %c129_64] : memref<8x512xf32, #tpu.memory_space<vmem>>, vector<8x256xf32>
    %cst_65 = arith.constant 0.000000e+00 : f32
    %65 = vector.broadcast %cst_65 : f32 to vector<8x256xf32>
    %66 = arith.select %9, %64, %65 : vector<8x256xi1>, vector<8x256xf32>
    %c40_66 = arith.constant 40 : index
    %c256_67 = arith.constant 256 : index
    %67 = vector.load %arg11[%c40_66, %c256_67] : memref<72x512xf32, #tpu.memory_space<vmem>>, vector<8x256xf32>
    tpu.vector_store %arg11[%c40_66, %c256_67], %66 {strides = array<i32>} : memref<72x512xf32, #tpu.memory_space<vmem>>, vector<8x256xf32>,
    %c0_68 = arith.constant 0 : index
    %c143_69 = arith.constant 143 : index
    %68 = vector.load %arg9[%c0_68, %c143_69] : memref<8x512xf32, #tpu.memory_space<vmem>>, vector<8x256xf32>
    %cst_70 = arith.constant 0.000000e+00 : f32
    %69 = vector.broadcast %cst_70 : f32 to vector<8x256xf32>
    %70 = arith.select %4, %68, %69 : vector<8x256xi1>, vector<8x256xf32>
    %c48_71 = arith.constant 48 : index
    %c256_72 = arith.constant 256 : index
    %71 = vector.load %arg11[%c48_71, %c256_72] : memref<72x512xf32, #tpu.memory_space<vmem>>, vector<8x256xf32>
    tpu.vector_store %arg11[%c48_71, %c256_72], %70 {strides = array<i32>} : memref<72x512xf32, #tpu.memory_space<vmem>>, vector<8x256xf32>,
    %c0_73 = arith.constant 0 : index
    %c144_74 = arith.constant 144 : index
    %72 = vector.load %arg9[%c0_73, %c144_74] : memref<8x512xf32, #tpu.memory_space<vmem>>, vector<8x256xf32>
    %c56_75 = arith.constant 56 : index
    %c256_76 = arith.constant 256 : index
    %73 = vector.load %arg11[%c56_75, %c256_76] : memref<72x512xf32, #tpu.memory_space<vmem>>, vector<8x256xf32>
    tpu.vector_store %arg11[%c56_75, %c256_76], %72 {strides = array<i32>} : memref<72x512xf32, #tpu.memory_space<vmem>>, vector<8x256xf32>,
    %c0_77 = arith.constant 0 : index
    %c145_78 = arith.constant 145 : index
    %74 = vector.load %arg9[%c0_77, %c145_78] : memref<8x512xf32, #tpu.memory_space<vmem>>, vector<8x256xf32>
    %cst_79 = arith.constant 0.000000e+00 : f32
    %75 = vector.broadcast %cst_79 : f32 to vector<8x256xf32>
    %76 = arith.select %9, %74, %75 : vector<8x256xi1>, vector<8x256xf32>
    %c64_80 = arith.constant 64 : index
    %c256_81 = arith.constant 256 : index
    %77 = vector.load %arg11[%c64_80, %c256_81] : memref<72x512xf32, #tpu.memory_space<vmem>>, vector<8x256xf32>
    tpu.vector_store %arg11[%c64_80, %c256_81], %76 {strides = array<i32>} : memref<72x512xf32, #tpu.memory_space<vmem>>, vector<8x256xf32>,
    %c0_82 = arith.constant 0 : index
    %c0_83 = arith.constant 0 : index
    %78 = vector.load %arg2[%c0_82, %c0_83] : memref<16x72xf32, #tpu.memory_space<vmem>>, vector<16x72xf32>
    %c0_84 = arith.constant 0 : index
    %c0_85 = arith.constant 0 : index
    %79 = vector.load %arg11[%c0_84, %c0_85] : memref<72x512xf32, #tpu.memory_space<vmem>>, vector<72x512xf32>
    %cst_86 = arith.constant dense<0.000000e+00> : vector<16x512xf32>
    %80 = tpu.matmul %78, %79, %cst_86 {dimension_numbers = #tpu.dot_dimension_numbers<[1], [0], [0], [1], [0, 0, 1, 1], [], []>} : vector<16x72xf32>, vector<72x512xf32>, vector<16x512xf32> -> vector<16x512xf32>
    %81 = vector.extract_strided_slice %80 {offsets = [0, 0], sizes = [8, 512], strides = [1, 1]} : vector<16x512xf32> to vector<8x512xf32>
    %c0_87 = arith.constant 0 : index
    %c0_88 = arith.constant 0 : index
    %82 = vector.load %arg3[%c0_87, %c0_88] : memref<8x1xf32, #tpu.memory_space<vmem>>, vector<8x1xf32>
    %83 = vector.broadcast %82 : vector<8x1xf32> to vector<8x512xf32>
    %84 = arith.addf %81, %83 : vector<8x512xf32>
    %cst_89 = arith.constant 0.000000e+00 : f32
    %85 = vector.broadcast %cst_89 : f32 to vector<8x512xf32>
    %86 = arith.maximumf %84, %85 : vector<8x512xf32>
    %87 = vector.extract_strided_slice %80 {offsets = [8, 0], sizes = [8, 512], strides = [1, 1]} : vector<16x512xf32> to vector<8x512xf32>
    %c0_90 = arith.constant 0 : index
    %c0_91 = arith.constant 0 : index
    %88 = vector.load %arg6[%c0_90, %c0_91] : memref<8x1xf32, #tpu.memory_space<vmem>>, vector<8x1xf32>
    %89 = vector.broadcast %88 : vector<8x1xf32> to vector<8x512xf32>
    %90 = arith.addf %87, %89 : vector<8x512xf32>
    %cst_92 = arith.constant 0.000000e+00 : f32
    %91 = vector.broadcast %cst_92 : f32 to vector<8x512xf32>
    %c0_93 = arith.constant 0 : index
    %c0_94 = arith.constant 0 : index
    %92 = vector.load %arg10[%c0_93, %c0_94] : memref<8x512xf32, #tpu.memory_space<vmem>>, vector<8x512xf32>
    tpu.vector_store %arg10[%c0_93, %c0_94], %91 {strides = array<i32>} : memref<8x512xf32, #tpu.memory_space<vmem>>, vector<8x512xf32>,
    %93 = vector.extract_strided_slice %86 {offsets = [0, 0], sizes = [8, 256], strides = [1, 1]} : vector<8x512xf32> to vector<8x256xf32>
    %c0_95 = arith.constant 0 : index
    %c128_96 = arith.constant 128 : index
    %94 = vector.load %arg10[%c0_95, %c128_96] : memref<8x512xf32, #tpu.memory_space<vmem>>, vector<8x256xf32>
    tpu.vector_store %arg10[%c0_95, %c128_96], %93 {strides = array<i32>} : memref<8x512xf32, #tpu.memory_space<vmem>>, vector<8x256xf32>,
    %c0_97 = arith.constant 0 : index
    %c111_98 = arith.constant 111 : index
    %95 = vector.load %arg10[%c0_97, %c111_98] : memref<8x512xf32, #tpu.memory_space<vmem>>, vector<8x256xf32>
    %cst_99 = arith.constant 0.000000e+00 : f32
    %96 = vector.broadcast %cst_99 : f32 to vector<8x256xf32>
    %97 = arith.select %4, %95, %96 : vector<8x256xi1>, vector<8x256xf32>
    %c0_100 = arith.constant 0 : index
    %c0_101 = arith.constant 0 : index
    %98 = vector.load %arg11[%c0_100, %c0_101] : memref<72x512xf32, #tpu.memory_space<vmem>>, vector<8x256xf32>
    tpu.vector_store %arg11[%c0_100, %c0_101], %97 {strides = array<i32>} : memref<72x512xf32, #tpu.memory_space<vmem>>, vector<8x256xf32>,
    %c0_102 = arith.constant 0 : index
    %c112_103 = arith.constant 112 : index
    %99 = vector.load %arg10[%c0_102, %c112_103] : memref<8x512xf32, #tpu.memory_space<vmem>>, vector<8x256xf32>
    %c8_104 = arith.constant 8 : index
    %c0_105 = arith.constant 0 : index
    %100 = vector.load %arg11[%c8_104, %c0_105] : memref<72x512xf32, #tpu.memory_space<vmem>>, vector<8x256xf32>
    tpu.vector_store %arg11[%c8_104, %c0_105], %99 {strides = array<i32>} : memref<72x512xf32, #tpu.memory_space<vmem>>, vector<8x256xf32>,
    %c0_106 = arith.constant 0 : index
    %c113_107 = arith.constant 113 : index
    %101 = vector.load %arg10[%c0_106, %c113_107] : memref<8x512xf32, #tpu.memory_space<vmem>>, vector<8x256xf32>
    %cst_108 = arith.constant 0.000000e+00 : f32
    %102 = vector.broadcast %cst_108 : f32 to vector<8x256xf32>
    %103 = arith.select %9, %101, %102 : vector<8x256xi1>, vector<8x256xf32>
    %c16_109 = arith.constant 16 : index
    %c0_110 = arith.constant 0 : index
    %104 = vector.load %arg11[%c16_109, %c0_110] : memref<72x512xf32, #tpu.memory_space<vmem>>, vector<8x256xf32>
    tpu.vector_store %arg11[%c16_109, %c0_110], %103 {strides = array<i32>} : memref<72x512xf32, #tpu.memory_space<vmem>>, vector<8x256xf32>,
    %c0_111 = arith.constant 0 : index
    %c127_112 = arith.constant 127 : index
    %105 = vector.load %arg10[%c0_111, %c127_112] : memref<8x512xf32, #tpu.memory_space<vmem>>, vector<8x256xf32>
    %cst_113 = arith.constant 0.000000e+00 : f32
    %106 = vector.broadcast %cst_113 : f32 to vector<8x256xf32>
    %107 = arith.select %4, %105, %106 : vector<8x256xi1>, vector<8x256xf32>
    %c24_114 = arith.constant 24 : index
    %c0_115 = arith.constant 0 : index
    %108 = vector.load %arg11[%c24_114, %c0_115] : memref<72x512xf32, #tpu.memory_space<vmem>>, vector<8x256xf32>
    tpu.vector_store %arg11[%c24_114, %c0_115], %107 {strides = array<i32>} : memref<72x512xf32, #tpu.memory_space<vmem>>, vector<8x256xf32>,
    %c0_116 = arith.constant 0 : index
    %c128_117 = arith.constant 128 : index
    %109 = vector.load %arg10[%c0_116, %c128_117] : memref<8x512xf32, #tpu.memory_space<vmem>>, vector<8x256xf32>
    %c32_118 = arith.constant 32 : index
    %c0_119 = arith.constant 0 : index
    %110 = vector.load %arg11[%c32_118, %c0_119] : memref<72x512xf32, #tpu.memory_space<vmem>>, vector<8x256xf32>
    tpu.vector_store %arg11[%c32_118, %c0_119], %109 {strides = array<i32>} : memref<72x512xf32, #tpu.memory_space<vmem>>, vector<8x256xf32>,
    %c0_120 = arith.constant 0 : index
    %c129_121 = arith.constant 129 : index
    %111 = vector.load %arg10[%c0_120, %c129_121] : memref<8x512xf32, #tpu.memory_space<vmem>>, vector<8x256xf32>
    %cst_122 = arith.constant 0.000000e+00 : f32
    %112 = vector.broadcast %cst_122 : f32 to vector<8x256xf32>
    %113 = arith.select %9, %111, %112 : vector<8x256xi1>, vector<8x256xf32>
    %c40_123 = arith.constant 40 : index
    %c0_124 = arith.constant 0 : index
    %114 = vector.load %arg11[%c40_123, %c0_124] : memref<72x512xf32, #tpu.memory_space<vmem>>, vector<8x256xf32>
    tpu.vector_store %arg11[%c40_123, %c0_124], %113 {strides = array<i32>} : memref<72x512xf32, #tpu.memory_space<vmem>>, vector<8x256xf32>,
    %c0_125 = arith.constant 0 : index
    %c143_126 = arith.constant 143 : index
    %115 = vector.load %arg10[%c0_125, %c143_126] : memref<8x512xf32, #tpu.memory_space<vmem>>, vector<8x256xf32>
    %cst_127 = arith.constant 0.000000e+00 : f32
    %116 = vector.broadcast %cst_127 : f32 to vector<8x256xf32>
    %117 = arith.select %4, %115, %116 : vector<8x256xi1>, vector<8x256xf32>
    %c48_128 = arith.constant 48 : index
    %c0_129 = arith.constant 0 : index
    %118 = vector.load %arg11[%c48_128, %c0_129] : memref<72x512xf32, #tpu.memory_space<vmem>>, vector<8x256xf32>
    tpu.vector_store %arg11[%c48_128, %c0_129], %117 {strides = array<i32>} : memref<72x512xf32, #tpu.memory_space<vmem>>, vector<8x256xf32>,
    %c0_130 = arith.constant 0 : index
    %c144_131 = arith.constant 144 : index
    %119 = vector.load %arg10[%c0_130, %c144_131] : memref<8x512xf32, #tpu.memory_space<vmem>>, vector<8x256xf32>
    %c56_132 = arith.constant 56 : index
    %c0_133 = arith.constant 0 : index
    %120 = vector.load %arg11[%c56_132, %c0_133] : memref<72x512xf32, #tpu.memory_space<vmem>>, vector<8x256xf32>
    tpu.vector_store %arg11[%c56_132, %c0_133], %119 {strides = array<i32>} : memref<72x512xf32, #tpu.memory_space<vmem>>, vector<8x256xf32>,
    %c0_134 = arith.constant 0 : index
    %c145_135 = arith.constant 145 : index
    %121 = vector.load %arg10[%c0_134, %c145_135] : memref<8x512xf32, #tpu.memory_space<vmem>>, vector<8x256xf32>
    %cst_136 = arith.constant 0.000000e+00 : f32
    %122 = vector.broadcast %cst_136 : f32 to vector<8x256xf32>
    %123 = arith.select %9, %121, %122 : vector<8x256xi1>, vector<8x256xf32>
    %c64_137 = arith.constant 64 : index
    %c0_138 = arith.constant 0 : index
    %124 = vector.load %arg11[%c64_137, %c0_138] : memref<72x512xf32, #tpu.memory_space<vmem>>, vector<8x256xf32>
    tpu.vector_store %arg11[%c64_137, %c0_138], %123 {strides = array<i32>} : memref<72x512xf32, #tpu.memory_space<vmem>>, vector<8x256xf32>,
    %125 = vector.extract_strided_slice %86 {offsets = [0, 256], sizes = [8, 256], strides = [1, 1]} : vector<8x512xf32> to vector<8x256xf32>
    %c0_139 = arith.constant 0 : index
    %c128_140 = arith.constant 128 : index
    %126 = vector.load %arg10[%c0_139, %c128_140] : memref<8x512xf32, #tpu.memory_space<vmem>>, vector<8x256xf32>
    tpu.vector_store %arg10[%c0_139, %c128_140], %125 {strides = array<i32>} : memref<8x512xf32, #tpu.memory_space<vmem>>, vector<8x256xf32>,
    %c0_141 = arith.constant 0 : index
    %c111_142 = arith.constant 111 : index
    %127 = vector.load %arg10[%c0_141, %c111_142] : memref<8x512xf32, #tpu.memory_space<vmem>>, vector<8x256xf32>
    %cst_143 = arith.constant 0.000000e+00 : f32
    %128 = vector.broadcast %cst_143 : f32 to vector<8x256xf32>
    %129 = arith.select %4, %127, %128 : vector<8x256xi1>, vector<8x256xf32>
    %c0_144 = arith.constant 0 : index
    %c256_145 = arith.constant 256 : index
    %130 = vector.load %arg11[%c0_144, %c256_145] : memref<72x512xf32, #tpu.memory_space<vmem>>, vector<8x256xf32>
    tpu.vector_store %arg11[%c0_144, %c256_145], %129 {strides = array<i32>} : memref<72x512xf32, #tpu.memory_space<vmem>>, vector<8x256xf32>,
    %c0_146 = arith.constant 0 : index
    %c112_147 = arith.constant 112 : index
    %131 = vector.load %arg10[%c0_146, %c112_147] : memref<8x512xf32, #tpu.memory_space<vmem>>, vector<8x256xf32>
    %c8_148 = arith.constant 8 : index
    %c256_149 = arith.constant 256 : index
    %132 = vector.load %arg11[%c8_148, %c256_149] : memref<72x512xf32, #tpu.memory_space<vmem>>, vector<8x256xf32>
    tpu.vector_store %arg11[%c8_148, %c256_149], %131 {strides = array<i32>} : memref<72x512xf32, #tpu.memory_space<vmem>>, vector<8x256xf32>,
    %c0_150 = arith.constant 0 : index
    %c113_151 = arith.constant 113 : index
    %133 = vector.load %arg10[%c0_150, %c113_151] : memref<8x512xf32, #tpu.memory_space<vmem>>, vector<8x256xf32>
    %cst_152 = arith.constant 0.000000e+00 : f32
    %134 = vector.broadcast %cst_152 : f32 to vector<8x256xf32>
    %135 = arith.select %9, %133, %134 : vector<8x256xi1>, vector<8x256xf32>
    %c16_153 = arith.constant 16 : index
    %c256_154 = arith.constant 256 : index
    %136 = vector.load %arg11[%c16_153, %c256_154] : memref<72x512xf32, #tpu.memory_space<vmem>>, vector<8x256xf32>
    tpu.vector_store %arg11[%c16_153, %c256_154], %135 {strides = array<i32>} : memref<72x512xf32, #tpu.memory_space<vmem>>, vector<8x256xf32>,
    %c0_155 = arith.constant 0 : index
    %c127_156 = arith.constant 127 : index
    %137 = vector.load %arg10[%c0_155, %c127_156] : memref<8x512xf32, #tpu.memory_space<vmem>>, vector<8x256xf32>
    %cst_157 = arith.constant 0.000000e+00 : f32
    %138 = vector.broadcast %cst_157 : f32 to vector<8x256xf32>
    %139 = arith.select %4, %137, %138 : vector<8x256xi1>, vector<8x256xf32>
    %c24_158 = arith.constant 24 : index
    %c256_159 = arith.constant 256 : index
    %140 = vector.load %arg11[%c24_158, %c256_159] : memref<72x512xf32, #tpu.memory_space<vmem>>, vector<8x256xf32>
    tpu.vector_store %arg11[%c24_158, %c256_159], %139 {strides = array<i32>} : memref<72x512xf32, #tpu.memory_space<vmem>>, vector<8x256xf32>,
    %c0_160 = arith.constant 0 : index
    %c128_161 = arith.constant 128 : index
    %141 = vector.load %arg10[%c0_160, %c128_161] : memref<8x512xf32, #tpu.memory_space<vmem>>, vector<8x256xf32>
    %c32_162 = arith.constant 32 : index
    %c256_163 = arith.constant 256 : index
    %142 = vector.load %arg11[%c32_162, %c256_163] : memref<72x512xf32, #tpu.memory_space<vmem>>, vector<8x256xf32>
    tpu.vector_store %arg11[%c32_162, %c256_163], %141 {strides = array<i32>} : memref<72x512xf32, #tpu.memory_space<vmem>>, vector<8x256xf32>,
    %c0_164 = arith.constant 0 : index
    %c129_165 = arith.constant 129 : index
    %143 = vector.load %arg10[%c0_164, %c129_165] : memref<8x512xf32, #tpu.memory_space<vmem>>, vector<8x256xf32>
    %cst_166 = arith.constant 0.000000e+00 : f32
    %144 = vector.broadcast %cst_166 : f32 to vector<8x256xf32>
    %145 = arith.select %9, %143, %144 : vector<8x256xi1>, vector<8x256xf32>
    %c40_167 = arith.constant 40 : index
    %c256_168 = arith.constant 256 : index
    %146 = vector.load %arg11[%c40_167, %c256_168] : memref<72x512xf32, #tpu.memory_space<vmem>>, vector<8x256xf32>
    tpu.vector_store %arg11[%c40_167, %c256_168], %145 {strides = array<i32>} : memref<72x512xf32, #tpu.memory_space<vmem>>, vector<8x256xf32>,
    %c0_169 = arith.constant 0 : index
    %c143_170 = arith.constant 143 : index
    %147 = vector.load %arg10[%c0_169, %c143_170] : memref<8x512xf32, #tpu.memory_space<vmem>>, vector<8x256xf32>
    %cst_171 = arith.constant 0.000000e+00 : f32
    %148 = vector.broadcast %cst_171 : f32 to vector<8x256xf32>
    %149 = arith.select %4, %147, %148 : vector<8x256xi1>, vector<8x256xf32>
    %c48_172 = arith.constant 48 : index
    %c256_173 = arith.constant 256 : index
    %150 = vector.load %arg11[%c48_172, %c256_173] : memref<72x512xf32, #tpu.memory_space<vmem>>, vector<8x256xf32>
    tpu.vector_store %arg11[%c48_172, %c256_173], %149 {strides = array<i32>} : memref<72x512xf32, #tpu.memory_space<vmem>>, vector<8x256xf32>,
    %c0_174 = arith.constant 0 : index
    %c144_175 = arith.constant 144 : index
    %151 = vector.load %arg10[%c0_174, %c144_175] : memref<8x512xf32, #tpu.memory_space<vmem>>, vector<8x256xf32>
    %c56_176 = arith.constant 56 : index
    %c256_177 = arith.constant 256 : index
    %152 = vector.load %arg11[%c56_176, %c256_177] : memref<72x512xf32, #tpu.memory_space<vmem>>, vector<8x256xf32>
    tpu.vector_store %arg11[%c56_176, %c256_177], %151 {strides = array<i32>} : memref<72x512xf32, #tpu.memory_space<vmem>>, vector<8x256xf32>,
    %c0_178 = arith.constant 0 : index
    %c145_179 = arith.constant 145 : index
    %153 = vector.load %arg10[%c0_178, %c145_179] : memref<8x512xf32, #tpu.memory_space<vmem>>, vector<8x256xf32>
    %cst_180 = arith.constant 0.000000e+00 : f32
    %154 = vector.broadcast %cst_180 : f32 to vector<8x256xf32>
    %155 = arith.select %9, %153, %154 : vector<8x256xi1>, vector<8x256xf32>
    %c64_181 = arith.constant 64 : index
    %c256_182 = arith.constant 256 : index
    %156 = vector.load %arg11[%c64_181, %c256_182] : memref<72x512xf32, #tpu.memory_space<vmem>>, vector<8x256xf32>
    tpu.vector_store %arg11[%c64_181, %c256_182], %155 {strides = array<i32>} : memref<72x512xf32, #tpu.memory_space<vmem>>, vector<8x256xf32>,
    %c0_183 = arith.constant 0 : index
    %c0_184 = arith.constant 0 : index
    %157 = vector.load %arg4[%c0_183, %c0_184] : memref<8x72xf32, #tpu.memory_space<vmem>>, vector<8x72xf32>
    %c0_185 = arith.constant 0 : index
    %c0_186 = arith.constant 0 : index
    %158 = vector.load %arg11[%c0_185, %c0_186] : memref<72x512xf32, #tpu.memory_space<vmem>>, vector<72x512xf32>
    %cst_187 = arith.constant dense<0.000000e+00> : vector<8x512xf32>
    %159 = tpu.matmul %157, %158, %cst_187 {dimension_numbers = #tpu.dot_dimension_numbers<[1], [0], [0], [1], [0, 0, 1, 1], [], []>} : vector<8x72xf32>, vector<72x512xf32>, vector<8x512xf32> -> vector<8x512xf32>
    %c0_188 = arith.constant 0 : index
    %c0_189 = arith.constant 0 : index
    %160 = vector.load %arg5[%c0_188, %c0_189] : memref<8x1xf32, #tpu.memory_space<vmem>>, vector<8x1xf32>
    %161 = vector.broadcast %160 : vector<8x1xf32> to vector<8x512xf32>
    %162 = arith.addf %159, %161 : vector<8x512xf32>
    %cst_190 = arith.constant 0.000000e+00 : f32
    %163 = vector.broadcast %cst_190 : f32 to vector<8x512xf32>
    %164 = arith.maximumf %162, %163 : vector<8x512xf32>
    %165 = arith.addf %90, %164 : vector<8x512xf32>
    %cst_191 = arith.constant 0.000000e+00 : f32
    %166 = vector.broadcast %cst_191 : f32 to vector<8x512xf32>
    %167 = arith.maximumf %165, %166 : vector<8x512xf32>
    %168 = vector.extract_strided_slice %167 {offsets = [0, 0], sizes = [8, 256], strides = [1, 1]} : vector<8x512xf32> to vector<8x256xf32>
    %c0_192 = arith.constant 0 : index
    %c0_193 = arith.constant 0 : index
    %c0_194 = arith.constant 0 : index
    %169 = vector.load %arg8[%c0_192, %c0_193, %c0_194] : memref<2x8x256xf32, #tpu.memory_space<vmem>>, vector<1x8x256xf32>
    %170 = vector.shape_cast %169 : vector<1x8x256xf32> to vector<8x256xf32>
    %171 = vector.shape_cast %168 : vector<8x256xf32> to vector<1x8x256xf32>
    tpu.vector_store %arg8[%c0_192, %c0_193, %c0_194], %171 {strides = array<i32>} : memref<2x8x256xf32, #tpu.memory_space<vmem>>, vector<1x8x256xf32>,
    %172 = vector.extract_strided_slice %167 {offsets = [0, 256], sizes = [8, 256], strides = [1, 1]} : vector<8x512xf32> to vector<8x256xf32>
    %c1_195 = arith.constant 1 : index
    %c0_196 = arith.constant 0 : index
    %c0_197 = arith.constant 0 : index
    %173 = vector.load %arg8[%c1_195, %c0_196, %c0_197] : memref<2x8x256xf32, #tpu.memory_space<vmem>>, vector<1x8x256xf32>
    %174 = vector.shape_cast %173 : vector<1x8x256xf32> to vector<8x256xf32>
    %175 = vector.shape_cast %172 : vector<8x256xf32> to vector<1x8x256xf32>
    tpu.vector_store %arg8[%c1_195, %c0_196, %c0_197], %175 {strides = array<i32>} : memref<2x8x256xf32, #tpu.memory_space<vmem>>, vector<1x8x256xf32>,
    return
  }
  func.func @transform_0(%arg0: i32) -> (i32, i32, i32) {
    %c0_i32 = arith.constant 0 : i32
    %c0_i32_0 = arith.constant 0 : i32
    %c0_i32_1 = arith.constant 0 : i32
    return %arg0, %c0_i32, %c0_i32_0 : i32, i32, i32
  }
  func.func @transform_1(%arg0: i32) -> (i32, i32) {
    %c0_i32 = arith.constant 0 : i32
    %c0_i32_0 = arith.constant 0 : i32
    %c0_i32_1 = arith.constant 0 : i32
    return %c0_i32, %c0_i32_0 : i32, i32
  }
  func.func @transform_2(%arg0: i32) -> (i32, i32) {
    %c0_i32 = arith.constant 0 : i32
    %c0_i32_0 = arith.constant 0 : i32
    %c0_i32_1 = arith.constant 0 : i32
    return %c0_i32, %c0_i32_0 : i32, i32
  }
  func.func @transform_3(%arg0: i32) -> (i32, i32) {
    %c0_i32 = arith.constant 0 : i32
    %c0_i32_0 = arith.constant 0 : i32
    %c0_i32_1 = arith.constant 0 : i32
    return %c0_i32, %c0_i32_0 : i32, i32
  }
  func.func @transform_4(%arg0: i32) -> (i32, i32) {
    %c0_i32 = arith.constant 0 : i32
    %c0_i32_0 = arith.constant 0 : i32
    %c0_i32_1 = arith.constant 0 : i32
    return %c0_i32, %c0_i32_0 : i32, i32
  }
  func.func @transform_5(%arg0: i32) -> (i32, i32) {
    %c0_i32 = arith.constant 0 : i32
    %c0_i32_0 = arith.constant 0 : i32
    %c0_i32_1 = arith.constant 0 : i32
    return %c0_i32, %c0_i32_0 : i32, i32
  }
  func.func @transform_6(%arg0: i32) -> (i32, i32) {
    %c0_i32 = arith.constant 0 : i32
    %c0_i32_0 = arith.constant 0 : i32
    %c0_i32_1 = arith.constant 0 : i32
    return %c0_i32, %c0_i32_0 : i32, i32
  }
  func.func @transform_7(%arg0: i32) -> (i32, i32, i32) {
    %c0_i32 = arith.constant 0 : i32
    %c0_i32_0 = arith.constant 0 : i32
    %c0_i32_1 = arith.constant 0 : i32
    return %arg0, %c0_i32, %c0_i32_0 : i32, i32, i32
  }
}

</mosaic_0001>

<bundles_post_ra>
// kernel: res_block_forward.1
= control target key start
LH: loop header
LB: loop body
LE: loop exit
PB: predicated region body
PF: predicated region fallthrough
CT: control target
= control target key end

     0   :  { %v1222_v1 = vmov 0.0   ;;  %s1223_s26 = smov 111   ;;  %s1224_s27 = smov 1   ;;  %vm215_vm0 = vcmask 908288   ;;  %vm196_vm1 = vcmask 916480   ;;  %vm175_vm4 = vcmask 924672   ;;  %s1734_s0 = inlined_call_operand.vmem [shape: f32[2,4,256], index: 0, kind: input, shape index: {}]   ;;  %s1735_s6 = inlined_call_operand.vmem [shape: f32[2,256], index: 6, kind: input, shape index: {}]   ;;  %s1736_s1 = inlined_call_operand.vmem [shape: f32[16,72], index: 1, kind: input, shape index: {}]   ;;  %s1737_s2 = inlined_call_operand.vmem [shape: f32[8,1], index: 2, kind: input, shape index: {}]   ;;  %s1738_s5 = inlined_call_operand.vmem [shape: f32[8,1], index: 5, kind: input, shape index: {}]   ;;  %s1739_s4 = inlined_call_operand.vmem [shape: f32[8,1], index: 4, kind: input, shape index: {}]   ;;  %s1740_s3 = inlined_call_operand.vmem [shape: f32[8,72], index: 3, kind: input, shape index: {}]   ;;  %s1741_s7 = inlined_call_operand.vmem [shape: f32[2,8,256], index: 7, kind: output, shape index: {}]  }
   0x1   :  { %v47_v0 = vld [vmem:[%s1734_s0] sm:$0xff]  ;;  %1105 = vrot.lane.b32.xlu1 %v1222_v1, %s1223_s26  ;;  %44 = vst [vmem:[#allocation2] sm:$0xff] %v1222_v1  ;;  %1120 = vrot.lane.b32.xlu2 %v1222_v1, %s1224_s27  ;;  %s1225_s28 = smov 113   ;;  %v1031_v2 = vld [vmem:[%s1734_s0 + $0x8] sm:$0xff]  ;;  %s1226_s8 = smov 127   ;;  %vm154_vm7 = vcmask 1039360  }
   0x2   :  { %45 = vst [vmem:[#allocation2 + $0x18] sm:$0xff] %v1222_v1  ;;  %s1227_s0 = smov 112   ;;  %s1228_s9 = smov 15   ;;  %v1030_v25 = vld [vmem:[%s1735_s6 + $0x1] ss:$2 sm:$0x3] }
   0x3   :  { %49 = vst [vmem:[#allocation1] ss:$2 sm:$0xff] %v47_v0  ;;  %s1229_s10 = smov 16   ;;  %s1230_s11 = smov 17   ;;  %v37_v27 = vperm.slane %v1030_v25, 0  ;;  %v38_v28 = vperm.slane %v1030_v25, 1 }
   0x4   :  { %v26_v36 = vld [vmem:[%s1735_s6] ss:$2 sm:$0x3]  ;;  %vm129_vm8 = vcmask 7168   ;;  %vm108_vm9 = vcmask 121856   ;;  %vm89_vm10 = vcmask 130048  }
   0x5   :  { %vm1391_vm2 = vcmp.gt.f32.partialorder %v37_v27, 0.0  ;;  %vm1395_vm3 = vcmp.gt.f32.partialorder %v38_v28, 0.0  ;;  %v28_v43 = vperm.slane %v26_v36, 0  ;;  %v29_v44 = vperm.slane %v26_v36, 1  ;;  %v883_v33 = vld [vmem:[%s1740_s3] sm:$0xff] }
   0x6   :  { %vm68_vm11 = vcmask 138240   ;;  %vm432_vm12 = vcmask 588800  }
   0x7   :  { %vm1411_vm5 = vcmp.gt.f32.partialorder %v28_v43, 0.0  ;;  %vm1415_vm6 = vcmp.gt.f32.partialorder %v29_v44, 0.0 }
   0x9   :  { %1110 = vrot.lane.b32.xlu1 %v1222_v1, %s1225_s28 }
   0xa   :  { %v50_v3 = vld.sshfl [vmem:[#allocation1] sm:$0xff pattern:$0x75316420]  ;;  %v51_v4 = vld.sshfl [vmem:[#allocation1 + $0x8] sm:$0xff pattern:$0x75316420] }
   0xb   :  { %54 = vst [vmem:[#allocation2] sm:$0xf] %v50_v3 }
   0xc   :  { %227 = vst [vmem:[#allocation1] ss:$2 sm:$0xff] %v1031_v2 }
   0xd   :  { %55 = vst [vmem:[#allocation2 + $0x18] sm:$0xf] %v51_v4 }
  0x11   :  { %1115 = vrot.lane.b32.xlu1 %v1222_v1, %s1226_s8 }
  0x12   :  { %v1288_v5 = vld [vmem:[#allocation2] sm:$0xff] }
  0x13   :  { %v1124_v6 = vpack.i.bf16 %v1288_v5, %v1222_v1  ;;  %v228_v7 = vld.sshfl [vmem:[#allocation1] sm:$0xff pattern:$0x75316420]  ;;  %v229_v8 = vld.sshfl [vmem:[#allocation1 + $0x8] sm:$0xff pattern:$0x75316420] }
  0x14   :  { %232 = vst [vmem:[#allocation2] sm:$0xf] %v228_v7  ;;  %v1292_v9 = vld [vmem:[#allocation2 + $0x18] sm:$0xff] }
  0x15   :  { %1125 = vrot.lane.b32.xlu2 %v1124_v6, %s1227_s0  ;;  %233 = vst [vmem:[#allocation2 + $0x18] sm:$0xf] %v229_v8  ;;  %v1139_v13 = vpack.i.bf16 0.0, %v1292_v9  ;;  %v1154_v17 = vpack.i.bf16 %v1292_v9, %v1288_v5 }
  0x1b   :  { %v1295_v10 = vld [vmem:[#allocation2] sm:$0xff] }
  0x1c   :  { %380 = vrot.lane.b32.xlu0 %v1295_v10, %s1223_s26  ;;  %v1299_v11 = vld [vmem:[#allocation2 + $0x18] sm:$0xff]  ;;  %v1144_v14 = vpack.i.bf16 %v1295_v10, %v1222_v1 }
  0x1d   :  { %342 = vrot.lane.b32.xlu2 %v1295_v10, %s1225_s28  ;;  %v1129_v12 = vpack.i.bf16 %v1299_v11, %v1295_v10  ;;  %v1149_v15 = vpack.i.bf16 0.0, %v1299_v11 }
  0x1f   :  { %1130 = vrot.lane.b32.xlu1 %v1129_v12, %s1227_s0 }
  0x24   :  { %382 = vrot.lane.b32.xlu0 %v1299_v11, %s1223_s26 }
  0x25   :  { %322 = vrot.lane.b32.xlu2 %v1295_v10, %s1226_s8 }
  0x27   :  { %302 = vrot.lane.b32.xlu1 %v1299_v11, %s1224_s27 }
  0x2c   :  { %344 = vrot.lane.b32.xlu0 %v1299_v11, %s1225_s28 }
  0x2d   :  { %209 = vrot.lane.b32.xlu2 %v1288_v5, %s1223_s26 }
  0x2f   :  { %1135 = vrot.lane.b32.xlu1 %v1222_v1, %s1228_s9 }
  0x34   :  { %324 = vrot.lane.b32.xlu0 %v1299_v11, %s1226_s8 }
  0x35   :  { %280 = vrot.lane.b32.xlu2 %v1295_v10, %s1228_s9 }
  0x37   :  { %1140 = vrot.lane.b32.xlu1 %v1139_v13, %s1227_s0 }
  0x3c   :  { %300 = vrot.lane.b32.xlu0 %v1295_v10, %s1224_s27 }
  0x3d   :  { %1145 = vrot.lane.b32.xlu2 %v1144_v14, %s1229_s10 }
  0x3f   :  { %169 = vrot.lane.b32.xlu1 %v1288_v5, %s1225_s28 }
  0x44   :  { %211 = vrot.lane.b32.xlu0 %v1292_v9, %s1223_s26 }
  0x45   :  { %171 = vrot.lane.b32.xlu2 %v1292_v9, %s1225_s28 }
  0x47   :  { %242 = vrot.lane.b32.xlu1 %v1295_v10, %s1230_s11 }
  0x4c   :  { %282 = vrot.lane.b32.xlu0 %v1299_v11, %s1228_s9 }
  0x4d   :  { %244 = vrot.lane.b32.xlu2 %v1299_v11, %s1230_s11 }
  0x4f   :  { %150 = vrot.lane.b32.xlu1 %v1292_v9, %s1226_s8 }
  0x54   :  { %1150 = vrot.lane.b32.xlu0 %v1149_v15, %s1229_s10 }
  0x55   :  { %125 = vrot.lane.b32.xlu2 %v1288_v5, %s1224_s27 }
  0x57   :  { %104 = vrot.lane.b32.xlu1 %v1288_v5, %s1228_s9 }
  0x5b   :  { %v1363_v16 = vpop.permute.xlu2 %1120 }
  0x5c   :  { %240 = vrot.lane.b32.xlu0 %v1222_v1, %s1230_s11  ;;  %v1122_v60 = vunpack.i.l.bf16 %v1363_v16 }
  0x5d   :  { %106 = vrot.lane.b32.xlu2 %v1292_v9, %s1228_s9 }
  0x5f   :  { %62 = vrot.lane.b32.xlu1 %v1222_v1, %s1230_s11 }
  0x64   :  { %148 = vrot.lane.b32.xlu0 %v1288_v5, %s1226_s8 }
  0x65   :  { %64 = vrot.lane.b32.xlu2 %v1288_v5, %s1230_s11 }
  0x6c   :  { %127 = vrot.lane.b32.xlu0 %v1292_v9, %s1224_s27 }
  0x6d   :  { %1171 = vrot.lane.b32.xlu2 %v1222_v1, %s1226_s8 }
  0x6f   :  { %v1372_v19 = vpop.permute.xlu2 %1125 }
  0x70   :  { %v1127_v29 = vunpack.i.l.bf16 %v1372_v19  ;;  %v1128_v12 = vunpack.i.h.bf16 %v1372_v19 }
  0x73   :  { %v1367_v18 = vpop.permute.xlu1 %1105 }
  0x74   :  { %1155 = vrot.lane.b32.xlu0 %v1154_v17, %s1229_s10  ;;  %v1107_v32 = vunpack.i.l.bf16 %v1367_v18  ;;  %v1108_v8 = vunpack.i.h.bf16 %v1367_v18 }
  0x75   :  { %1181 = vrot.lane.b32.xlu2 %v1222_v1, %s1228_s9 }
  0x77   :  { %v343_v21 = vpop.permute.xlu2 %342 }
  0x7b   :  { %v1376_v20 = vpop.permute.xlu1 %1110 }
  0x7c   :  { %66 = vrot.lane.b32.xlu0 %v1292_v9, %s1230_s11  ;;  %v1112_v45 = vunpack.i.l.bf16 %v1376_v20 }
  0x7f   :  { %v323_v23 = vpop.permute.xlu2 %322 }
  0x83   :  { %v1380_v22 = vpop.permute.xlu1 %1115 }
  0x84   :  { %1166 = vrot.lane.b32.xlu0 %v1222_v1, %s1225_s28  ;;  %v1117_v53 = vunpack.i.l.bf16 %v1380_v22 }
  0x87   :  { %v210_v41 = vpop.permute.xlu2 %209 }
  0x8c   :  { %1176 = vrot.lane.b32.xlu0 %v1222_v1, %s1224_s27 }
  0x8e   :  { %v381_v24 = vpop.permute.xlu0 %380 }
  0x8f   :  { %v281_v52 = vpop.permute.xlu2 %280 }
  0x91   :  { %v1131_v26 = vpop.permute.xlu1 %1130 }
  0x92   :  { %v1133_v30 = vunpack.i.h.bf16 %v1131_v26  ;;  %v1132_v31 = vunpack.i.l.bf16 %v1131_v26 }
  0x94   :  { %1186 = vrot.lane.b32.xlu0 %v1222_v1, %s1230_s11  ;;  %v368_v39 = vsel %vm196_vm1, %v1132_v31, %v1133_v30  ;;  %v369_v40 = vsel %vm196_vm1, %v1133_v30, %v1127_v29 }
  0x96   :  { %v383_v35 = vpop.permute.xlu0 %382 }
  0x97   :  { %v386_v37 = vsel %vm215_vm0, %v381_v24, %v383_v35  ;;  %v387_v38 = vsel %vm215_vm0, %v383_v35, %v1107_v32  ;;  %v1146_v59 = vpop.permute.xlu2 %1145 }
  0x98   :  { %1058 = vmatpush.msk.msra.mxu2 %vm1391_vm2, %v386_v37  ;;  %1064 = vmatpush.msk.msra.mxu3 %vm1395_vm3, %v387_v38  ;;  %v1148_v61 = vunpack.i.h.bf16 %v1146_v59  ;;  %v1147_v62 = vunpack.i.l.bf16 %v1146_v59  ;;  %v531_v37 = vld [vmem:[%s1737_s2] sm:$0xff]  ;;  %v1231_v38 = vmov 0  }
  0x99   :  { %v303_v42 = vpop.permute.xlu1 %302  ;;  %1159 = vset.pattern.permute.xlu1 %v1231_v38  ;;  %1221 = vset.pattern.permute.xlu0 %v1231_v38 }
  0x9a   :  { %493 = vmatpush.msra.mxu2 %v368_v39  ;;  %516 = vmatpush.msra.mxu3 %v369_v40  ;;  %v266_v6 = vsel %vm89_vm10, %v1147_v62, %v1148_v61 }
  0x9b   :  { %534 = vperm.xlu1 %1159, %v531_v37   ;;  %1220 = vset.pattern.permute.xlu2 %v1231_v38 }
  0x9e   :  { %v345_v48 = vpop.permute.xlu0 %344 }
  0x9f   :  { %v348_v49 = vsel %vm175_vm4, %v343_v21, %v345_v48  ;;  %v349_v50 = vsel %vm175_vm4, %v345_v48, %v1112_v45  ;;  %v172_v17 = vpop.permute.xlu2 %171  ;;  %v1113_v21 = vunpack.i.h.bf16 %v1376_v20  ;;  %v1118_v20 = vunpack.i.h.bf16 %v1380_v22  ;;  %v394_v22 = vld [vmem:[%s1736_s1] sm:$0xff] }
  0xa0   :  { %1059 = vmatpush.msk.msra.mxu2 %vm1411_vm5, %v348_v49  ;;  %1065 = vmatpush.msk.msra.mxu3 %vm1415_vm6, %v349_v50 }
  0xa1   :  { %v1425_v51 = vpop.permute.xlu1 %1135  ;;  %v177_v24 = vsel %vm175_vm4, %v172_v17, %v1113_v21 }
  0xa2   :  { %v1137_v58 = vunpack.i.l.bf16 %v1425_v51  ;;  %v1138_v44 = vunpack.i.h.bf16 %v1425_v51 }
  0xa3   :  { %1161 = vrot.lane.b32.xlu1 %v1222_v1, %s1223_s26 }
  0xa4   :  { %v284_v3 = vsel %vm108_vm9, %v1137_v58, %v281_v52 }
  0xa6   :  { %v325_v54 = vpop.permute.xlu0 %324 }
  0xa7   :  { %v328_v55 = vsel %vm154_vm7, %v323_v23, %v325_v54  ;;  %v329_v56 = vsel %vm154_vm7, %v325_v54, %v1117_v53  ;;  %v245_v31 = vpop.permute.xlu2 %244 }
  0xa8   :  { %1060 = vmatpush.msk.msra.mxu2 %vm1391_vm2, %v328_v55  ;;  %1066 = vmatpush.msk.msra.mxu3 %vm1395_vm3, %v329_v56 }
  0xa9   :  { %v1141_v57 = vpop.permute.xlu1 %1140 }
  0xaa   :  { %496 = vmatpush.msra.mxu2 %v1295_v10  ;;  %519 = vmatpush.msra.mxu3 %v1299_v11  ;;  %v1143_v7 = vunpack.i.h.bf16 %v1141_v57  ;;  %v1142_v10 = vunpack.i.l.bf16 %v1141_v57 }
  0xac   :  { %v198_v15 = vsel %vm196_vm1, %v1142_v10, %v1143_v7  ;;  %v197_v18 = vsel %vm196_vm1, %v1128_v12, %v1142_v10 }
  0xae   :  { %v301_v63 = vpop.permute.xlu0 %300 }
  0xaf   :  { %v304_v0 = vsel %vm129_vm8, %v1122_v60, %v301_v63  ;;  %v305_v2 = vsel %vm129_vm8, %v301_v63, %v303_v42  ;;  %v126_v39 = vpop.permute.xlu2 %125  ;;  %v1123_v42 = vunpack.i.h.bf16 %v1363_v16 }
  0xb0   :  { %1061 = vmatpush.msk.msra.mxu2 %vm1411_vm5, %v304_v0  ;;  %1067 = vmatpush.msk.msra.mxu3 %vm1415_vm6, %v305_v2 }
  0xb1   :  { %v170_v4 = vpop.permute.xlu1 %169  ;;  %v130_v45 = vsel %vm129_vm8, %v1123_v42, %v126_v39 }
  0xb2   :  { %1062 = vmatpush.msk.msra.mxu2 %vm1391_vm2, %v284_v3  ;;  %v176_v19 = vsel %vm175_vm4, %v170_v4, %v172_v17 }
  0xb4   :  { %499 = vmatpush.msra.mxu2 %v266_v6 }
  0xb6   :  { %v212_v11 = vpop.permute.xlu0 %211 }
  0xb7   :  { %v216_v13 = vsel %vm215_vm0, %v210_v41, %v212_v11  ;;  %v217_v14 = vsel %vm215_vm0, %v212_v11, %v1108_v8  ;;  %v107_v48 = vpop.permute.xlu2 %106 }
  0xb8   :  { %1046 = vmatpush.msk.msra.mxu0 %vm1391_vm2, %v216_v13  ;;  %1052 = vmatpush.msk.msra.mxu1 %vm1395_vm3, %v217_v14 }
  0xb9   :  { %v243_v23 = vpop.permute.xlu1 %242 }
  0xba   :  { %447 = vmatpush.msra.mxu0 %v197_v18  ;;  %470 = vmatpush.msra.mxu1 %v198_v15  ;;  %v247_v35 = vsel %vm68_vm11, %v243_v23, %v245_v31 }
  0xbc   :  { %1053 = vmatpush.msk.msra.mxu1 %vm1415_vm6, %v177_v24  ;;  %1047 = vmatpush.msk.msra.mxu0 %vm1411_vm5, %v176_v19 }
  0xbe   :  { %v283_v25 = vpop.permute.xlu0 %282 }
  0xbf   :  { %v285_v26 = vsel %vm108_vm9, %v281_v52, %v283_v25  ;;  %v65_v51 = vpop.permute.xlu2 %64 }
  0xc0   :  { %1068 = vmatpush.msk.msra.mxu3 %vm1395_vm3, %v285_v26 }
  0xc1   :  { %v151_v27 = vpop.permute.xlu1 %150 }
  0xc2   :  { %v156_v28 = vsel %vm154_vm7, %v151_v27, %v1118_v20 }
  0xc3   :  { %1054 = vmatpush.msk.msra.mxu1 %vm1395_vm3, %v156_v28 }
  0xc5   :  { %473 = vmatpush.msra.mxu1 %v1292_v9 }
  0xc6   :  { %v1151_v29 = vpop.permute.xlu0 %1150 }
  0xc7   :  { %v1152_v30 = vunpack.i.l.bf16 %v1151_v29  ;;  %v1153_v54 = vunpack.i.h.bf16 %v1151_v29  ;;  %v1587_v19 = vpop.permute.xlu2 %1171 }
  0xc9   :  { %v267_v32 = vsel %vm89_vm10, %v1148_v61, %v1152_v30  ;;  %v105_v43 = vpop.permute.xlu1 %104 }
  0xca   :  { %522 = vmatpush.msra.mxu3 %v267_v32  ;;  %v109_v49 = vsel %vm108_vm9, %v1138_v44, %v105_v43 }
  0xcc   :  { %1069 = vmatpush.msk.msra.mxu3 %vm1415_vm6, %v247_v35 }
  0xcd   :  { %1038 = vmatmul.msk.f32.vlgmr.msra.gmra.mxu3 %vm432_vm12, %v394_v22 }
  0xce   :  { %v241_v9 = vpop.permute.xlu0 %240 }
  0xcf   :  { %v246_v36 = vsel %vm68_vm11, %v241_v9, %v243_v23 }
  0xd0   :  { %1063 = vmatpush.msk.msra.mxu2 %vm1411_vm5, %v246_v36 }
  0xd1   :  { %1036 = vmatmul.msk.f32.vlgmr.msra.gmra.mxu2 %vm432_vm12, %v394_v22  ;;  %v63_v53 = vpop.permute.xlu1 %62 }
  0xd2   :  { %v69_v59 = vsel %vm68_vm11, %v63_v53, %v65_v51 }
  0xd6   :  { %v149_v40 = vpop.permute.xlu0 %148 }
  0xd7   :  { %v155_v41 = vsel %vm154_vm7, %v149_v40, %v151_v27 }
  0xd8   :  { %1048 = vmatpush.msk.msra.mxu0 %vm1391_vm2, %v155_v41 }
  0xda   :  { %450 = vmatpush.msra.mxu0 %v1288_v5  ;;  %v110_v5 = vsel %vm108_vm9, %v105_v43, %v107_v48 }
  0xdc   :  { %1049 = vmatpush.msk.msra.mxu0 %vm1411_vm5, %v130_v45  ;;  %v1174_v45 = vunpack.i.h.bf16 %v1587_v19 }
  0xde   :  { %v128_v50 = vpop.permute.xlu0 %127  ;;  %1050 = vmatpush.msk.msra.mxu0 %vm1391_vm2, %v109_v49 }
  0xdf   :  { %v131_v16 = vsel %vm129_vm8, %v126_v39, %v128_v50 }
  0xe0   :  { %1055 = vmatpush.msk.msra.mxu1 %vm1415_vm6, %v131_v16 }
  0xe2   :  { %1056 = vmatpush.msk.msra.mxu1 %vm1395_vm3, %v110_v5 }
  0xe6   :  { %v1156_v52 = vpop.permute.xlu0 %1155 }
  0xe7   :  { %v1158_v55 = vunpack.i.h.bf16 %v1156_v52  ;;  %v1157_v56 = vunpack.i.l.bf16 %v1156_v52 }
  0xe9   :  { %v90_v57 = vsel %vm89_vm10, %v1153_v54, %v1157_v56  ;;  %v91_v58 = vsel %vm89_vm10, %v1157_v56, %v1158_v55 }
  0xea   :  { %453 = vmatpush.msra.mxu0 %v90_v57  ;;  %476 = vmatpush.msra.mxu1 %v91_v58 }
  0xec   :  { %1051 = vmatpush.msk.msra.mxu0 %vm1411_vm5, %v69_v59 }
  0xed   :  { %1032 = vmatmul.msk.f32.vlgmr.msra.gmra.mxu0 %vm432_vm12, %v394_v22 }
  0xee   :  { %v67_v60 = vpop.permute.xlu0 %66 }
  0xef   :  { %v70_v61 = vsel %vm68_vm11, %v65_v51, %v67_v60 }
  0xf0   :  { %1057 = vmatpush.msk.msra.mxu1 %vm1415_vm6, %v70_v61 }
  0xf1   :  { %1034 = vmatmul.msk.f32.vlgmr.msra.gmra.mxu1 %vm432_vm12, %v394_v22 }
  0xf6   :  { %v1594_v24 = vpop.permute.xlu0 %1166 }
  0xf7   :  { %v1169_v38 = vunpack.i.h.bf16 %v1594_v24 }
  0xfe   :  { %v1602_v28 = vpop.permute.xlu0 %1176 }
  0xff   :  { %v1179_v53 = vunpack.i.h.bf16 %v1602_v28 }
 0x106   :  { %v1604_v30 = vpop.permute.xlu0 %1186 }
 0x10d   :  { %v535_v62 = vpop.permute.xlu1 %534 }
 0x115   :  { %v1596_v25 = vpop.permute.xlu1 %1161 }
 0x116   :  { %v1164_v26 = vunpack.i.h.bf16 %v1596_v25 }
 0x150   :  { %v525_v12 = vpop.f32.mrf.mxu3 }
 0x151   :  { %v540_v13 = vadd.f32 %v535_v62, %v525_v12 }
 0x153   :  { %v1549_v15 = vmax.f32 %v540_v13, 0.0 }
 0x154   :  { %v502_v10 = vpop.f32.mrf.mxu2 }
 0x155   :  { %v539_v11 = vadd.f32 %v535_v62, %v502_v10  ;;  %v1210_v21 = vpack.i.bf16 0.0, %v1549_v15 }
 0x157   :  { %v1543_v14 = vmax.f32 %v539_v11, 0.0  ;;  %v1168_v11 = vunpack.i.l.bf16 %v1594_v24  ;;  %v1173_v24 = vunpack.i.l.bf16 %v1587_v19  ;;  %v920_v19 = vld [vmem:[%s1739_s4] sm:$0xff] }
 0x159   :  { %v1200_v17 = vpack.i.bf16 %v1549_v15, %v1543_v14  ;;  %v1205_v18 = vpack.i.bf16 %v1543_v14, %v1222_v1 }
 0x16a   :  { %v456_v63 = vpop.f32.mrf.mxu0 }
 0x16b   :  { %v537_v0 = vadd.f32 %v535_v62, %v456_v63  ;;  %v1163_v63 = vunpack.i.l.bf16 %v1596_v25 }
 0x16d   :  { %v1518_v2 = vmax.f32 %v537_v0, 0.0 }
 0x16e   :  { %v479_v3 = vpop.f32.mrf.mxu1 }
 0x16f   :  { %v538_v4 = vadd.f32 %v535_v62, %v479_v3  ;;  %707 = vrot.lane.b32.xlu1 %v1518_v2, %s1223_s26  ;;  %v1190_v6 = vpack.i.bf16 %v1518_v2, %v1222_v1  ;;  %v1592_v1 = vpop.permute.xlu2 %1181  ;;  %v395_v62 = vld [vmem:[%s1736_s1 + $0x8] sm:$0xff] }
 0x170   :  { %v1184_v55 = vunpack.i.h.bf16 %v1592_v1  ;;  %1033 = vmatmul.msk.f32.gmra.mxu0 %vm432_vm12, %v395_v62  ;;  %1037 = vmatmul.msk.f32.gmra.mxu2 %vm432_vm12, %v395_v62 }
 0x171   :  { %v1524_v7 = vmax.f32 %v538_v4, 0.0  ;;  %1191 = vrot.lane.b32.xlu0 %v1190_v6, %s1227_s0  ;;  %1039 = vmatmul.msk.f32.gmra.mxu3 %vm432_vm12, %v395_v62 }
 0x172   :  { %1035 = vmatmul.msk.f32.gmra.mxu1 %vm432_vm12, %v395_v62 }
 0x173   :  { %709 = vrot.lane.b32.xlu2 %v1524_v7, %s1223_s26  ;;  %v1195_v8 = vpack.i.bf16 0.0, %v1524_v7  ;;  %v1215_v23 = vpack.i.bf16 %v1524_v7, %v1518_v2 }
 0x177   :  { %669 = vrot.lane.b32.xlu1 %v1518_v2, %s1225_s28 }
 0x179   :  { %1196 = vrot.lane.b32.xlu0 %v1195_v8, %s1227_s0 }
 0x17b   :  { %671 = vrot.lane.b32.xlu2 %v1524_v7, %s1225_s28 }
 0x17f   :  { %651 = vrot.lane.b32.xlu1 %v1524_v7, %s1226_s8 }
 0x181   :  { %649 = vrot.lane.b32.xlu0 %v1518_v2, %s1226_s8 }
 0x183   :  { %629 = vrot.lane.b32.xlu2 %v1524_v7, %s1224_s27 }
 0x187   :  { %627 = vrot.lane.b32.xlu1 %v1518_v2, %s1224_s27 }
 0x189   :  { %607 = vrot.lane.b32.xlu0 %v1518_v2, %s1228_s9 }
 0x18b   :  { %869 = vrot.lane.b32.xlu2 %v1543_v14, %s1223_s26 }
 0x18f   :  { %609 = vrot.lane.b32.xlu1 %v1524_v7, %s1228_s9 }
 0x191   :  { %871 = vrot.lane.b32.xlu0 %v1549_v15, %s1223_s26 }
 0x193   :  { %1201 = vrot.lane.b32.xlu2 %v1200_v17, %s1227_s0 }
 0x197   :  { %831 = vrot.lane.b32.xlu1 %v1543_v14, %s1225_s28 }
 0x199   :  { %811 = vrot.lane.b32.xlu0 %v1543_v14, %s1226_s8 }
 0x19b   :  { %833 = vrot.lane.b32.xlu2 %v1549_v15, %s1225_s28 }
 0x19f   :  { %813 = vrot.lane.b32.xlu1 %v1549_v15, %s1226_s8 }
 0x1a1   :  { %769 = vrot.lane.b32.xlu0 %v1543_v14, %s1228_s9 }
 0x1a3   :  { %791 = vrot.lane.b32.xlu2 %v1549_v15, %s1224_s27 }
 0x1a7   :  { %789 = vrot.lane.b32.xlu1 %v1543_v14, %s1224_s27 }
 0x1a9   :  { %1211 = vrot.lane.b32.xlu0 %v1210_v21, %s1229_s10 }
 0x1ab   :  { %1206 = vrot.lane.b32.xlu2 %v1205_v18, %s1229_s10 }
 0x1af   :  { %771 = vrot.lane.b32.xlu1 %v1549_v15, %s1228_s9 }
 0x1b1   :  { %569 = vrot.lane.b32.xlu0 %v1518_v2, %s1230_s11 }
 0x1b3   :  { %733 = vrot.lane.b32.xlu2 %v1549_v15, %s1230_s11 }
 0x1b7   :  { %731 = vrot.lane.b32.xlu1 %v1543_v14, %s1230_s11 }
 0x1bb   :  { %1216 = vrot.lane.b32.xlu2 %v1215_v23, %s1229_s10 }
 0x1bf   :  { %571 = vrot.lane.b32.xlu1 %v1524_v7, %s1230_s11 }
 0x1c3   :  { %923 = vperm.xlu2 %1220, %v920_v19  }
 0x1cd   :  { %v710_v20 = vpop.permute.xlu2 %709 }
 0x1ce   :  { %v714_v27 = vsel %vm215_vm0, %v710_v20, %v1164_v26 }
 0x1cf   :  { %1076 = vmatpush.msk.msrb.mxu1 %vm1395_vm3, %v714_v27 }
 0x1d5   :  { %v672_v29 = vpop.permute.xlu2 %671 }
 0x1d6   :  { %v676_v49 = vsel %vm175_vm4, %v672_v29, %v1169_v38 }
 0x1dd   :  { %v630_v31 = vpop.permute.xlu2 %629 }
 0x1e1   :  { %v708_v32 = vpop.permute.xlu1 %707 }
 0x1e2   :  { %v713_v35 = vsel %vm215_vm0, %v708_v32, %v710_v20 }
 0x1e3   :  { %v1192_v22 = vpop.permute.xlu0 %1191  ;;  %1070 = vmatpush.msk.msrb.mxu0 %vm1391_vm2, %v713_v35 }
 0x1e4   :  { %v1194_v39 = vunpack.i.h.bf16 %v1192_v22  ;;  %v1193_v6 = vunpack.i.l.bf16 %v1192_v22 }
 0x1e5   :  { %v870_v9 = vpop.permute.xlu2 %869 }
 0x1e9   :  { %v670_v36 = vpop.permute.xlu1 %669 }
 0x1ea   :  { %v675_v48 = vsel %vm175_vm4, %v670_v36, %v672_v29 }
 0x1eb   :  { %v1197_v37 = vpop.permute.xlu0 %1196 }
 0x1ec   :  { %v1199_v40 = vunpack.i.h.bf16 %v1197_v37  ;;  %v1198_v41 = vunpack.i.l.bf16 %v1197_v37  ;;  %v1183_v37 = vunpack.i.l.bf16 %v1592_v1 }
 0x1ed   :  { %v1202_v42 = vpop.permute.xlu2 %1201 }
 0x1ee   :  { %v695_v43 = vsel %vm196_vm1, %v1194_v39, %v1198_v41  ;;  %v696_v44 = vsel %vm196_vm1, %v1198_v41, %v1199_v40  ;;  %v1204_v0 = vunpack.i.h.bf16 %v1202_v42 }
 0x1ef   :  { %937 = vmatpush.msrb.mxu0 %v695_v43  ;;  %957 = vmatpush.msrb.mxu1 %v696_v44 }
 0x1f0   :  { %v858_v13 = vsel %vm196_vm1, %v1204_v0, %v1193_v6 }
 0x1f1   :  { %1071 = vmatpush.msk.msrb.mxu0 %vm1411_vm5, %v675_v48  ;;  %v652_v50 = vpop.permute.xlu1 %651  ;;  %1077 = vmatpush.msk.msrb.mxu1 %vm1415_vm6, %v676_v49  ;;  %v1189_v48 = vunpack.i.h.bf16 %v1604_v30 }
 0x1f2   :  { %v656_v16 = vsel %vm154_vm7, %v652_v50, %v1174_v45 }
 0x1f3   :  { %v650_v5 = vpop.permute.xlu0 %649  ;;  %1078 = vmatpush.msk.msrb.mxu1 %vm1395_vm3, %v656_v16 }
 0x1f4   :  { %v655_v51 = vsel %vm154_vm7, %v650_v5, %v652_v50 }
 0x1f5   :  { %v834_v52 = vpop.permute.xlu2 %833  ;;  %1072 = vmatpush.msk.msrb.mxu0 %vm1391_vm2, %v655_v51  ;;  %960 = vmatpush.msrb.mxu1 %v1524_v7  ;;  %v1188_v51 = vunpack.i.l.bf16 %v1604_v30  ;;  %v459_v30 = vpop.f32.mrf.mxu0 }
 0x1f6   :  { %v838_v17 = vsel %vm175_vm4, %v834_v52, %v1168_v11 }
 0x1f7   :  { %940 = vmatpush.msrb.mxu0 %v1518_v2  ;;  %v1203_v2 = vunpack.i.l.bf16 %v1202_v42 }
 0x1f9   :  { %v628_v54 = vpop.permute.xlu1 %627  ;;  %v857_v12 = vsel %vm196_vm1, %v1203_v2, %v1204_v0 }
 0x1fa   :  { %v631_v56 = vsel %vm129_vm8, %v1179_v53, %v628_v54  ;;  %v632_v57 = vsel %vm129_vm8, %v628_v54, %v630_v31  ;;  %v545_v31 = vld [vmem:[%s1738_s5] sm:$0xff] }
 0x1fb   :  { %v608_v58 = vpop.permute.xlu0 %607  ;;  %1073 = vmatpush.msk.msrb.mxu0 %vm1411_vm5, %v631_v56  ;;  %1079 = vmatpush.msk.msrb.mxu1 %vm1415_vm6, %v632_v57 }
 0x1fc   :  { %v611_v59 = vsel %vm108_vm9, %v1184_v55, %v608_v58  ;;  %548 = vperm.xlu0 %1221, %v545_v31  }
 0x1fd   :  { %v792_v60 = vpop.permute.xlu2 %791  ;;  %1074 = vmatpush.msk.msrb.mxu0 %vm1391_vm2, %v611_v59 }
 0x201   :  { %v610_v61 = vpop.permute.xlu1 %609 }
 0x202   :  { %v612_v3 = vsel %vm108_vm9, %v608_v58, %v610_v61  ;;  %v528_v61 = vpop.f32.mrf.mxu3 }
 0x203   :  { %v872_v4 = vpop.permute.xlu0 %871  ;;  %1080 = vmatpush.msk.msrb.mxu1 %vm1395_vm3, %v612_v3 }
 0x204   :  { %v875_v7 = vsel %vm215_vm0, %v870_v9, %v872_v4  ;;  %v876_v8 = vsel %vm215_vm0, %v872_v4, %v1163_v63  ;;  %v1178_v9 = vunpack.i.l.bf16 %v1602_v28  ;;  %v482_v63 = vpop.f32.mrf.mxu1 }
 0x205   :  { %v1651_v10 = vpop.permute.xlu2 %1206  ;;  %1082 = vmatpush.msk.msrb.mxu2 %vm1391_vm2, %v875_v7  ;;  %1088 = vmatpush.msk.msrb.mxu3 %vm1395_vm3, %v876_v8 }
 0x206   :  { %v1209_v39 = vunpack.i.h.bf16 %v1651_v10  ;;  %v1208_v40 = vunpack.i.l.bf16 %v1651_v10 }
 0x207   :  { %977 = vmatpush.msrb.mxu2 %v857_v12  ;;  %997 = vmatpush.msrb.mxu3 %v858_v13 }
 0x208   :  { %v755_v43 = vsel %vm89_vm10, %v1208_v40, %v1209_v39 }
 0x209   :  { %v832_v21 = vpop.permute.xlu1 %831  ;;  %1089 = vmatpush.msk.msrb.mxu3 %vm1415_vm6, %v838_v17 }
 0x20a   :  { %v837_v18 = vsel %vm175_vm4, %v832_v21, %v834_v52 }
 0x20b   :  { %v812_v23 = vpop.permute.xlu0 %811  ;;  %1083 = vmatpush.msk.msrb.mxu2 %vm1411_vm5, %v837_v18 }
 0x20d   :  { %v734_v25 = vpop.permute.xlu2 %733 }
 0x211   :  { %v814_v26 = vpop.permute.xlu1 %813 }
 0x212   :  { %v817_v20 = vsel %vm154_vm7, %v812_v23, %v814_v26  ;;  %v818_v27 = vsel %vm154_vm7, %v814_v26, %v1173_v24 }
 0x213   :  { %v770_v29 = vpop.permute.xlu0 %769  ;;  %1084 = vmatpush.msk.msrb.mxu2 %vm1391_vm2, %v817_v20  ;;  %1090 = vmatpush.msk.msrb.mxu3 %vm1395_vm3, %v818_v27 }
 0x214   :  { %v773_v1 = vsel %vm108_vm9, %v1183_v37, %v770_v29 }
 0x215   :  { %v1217_v32 = vpop.permute.xlu2 %1216  ;;  %980 = vmatpush.msrb.mxu2 %v1543_v14  ;;  %1000 = vmatpush.msrb.mxu3 %v1549_v15 }
 0x216   :  { %v1219_v35 = vunpack.i.h.bf16 %v1217_v32  ;;  %v1218_v22 = vunpack.i.l.bf16 %v1217_v32 }
 0x218   :  { %v594_v36 = vsel %vm89_vm10, %v1218_v22, %v1219_v35 }
 0x219   :  { %v790_v38 = vpop.permute.xlu1 %789  ;;  %963 = vmatpush.msrb.mxu1 %v594_v36 }
 0x21a   :  { %v793_v14 = vsel %vm129_vm8, %v1178_v9, %v790_v38  ;;  %v794_v15 = vsel %vm129_vm8, %v790_v38, %v792_v60  ;;  %v505_v60 = vpop.f32.mrf.mxu2 }
 0x21b   :  { %v1212_v41 = vpop.permute.xlu0 %1211  ;;  %1085 = vmatpush.msk.msrb.mxu2 %vm1411_vm5, %v793_v14  ;;  %1091 = vmatpush.msk.msrb.mxu3 %vm1415_vm6, %v794_v15 }
 0x21c   :  { %v1214_v28 = vunpack.i.h.bf16 %v1212_v41  ;;  %v1213_v44 = vunpack.i.l.bf16 %v1212_v41 }
 0x21d   :  { %1086 = vmatpush.msk.msrb.mxu2 %vm1391_vm2, %v773_v1  ;;  %v924_v56 = vpop.permute.xlu2 %923 }
 0x21e   :  { %v593_v42 = vsel %vm89_vm10, %v1214_v28, %v1218_v22  ;;  %v756_v5 = vsel %vm89_vm10, %v1209_v39, %v1213_v44 }
 0x21f   :  { %943 = vmatpush.msrb.mxu0 %v593_v42  ;;  %983 = vmatpush.msrb.mxu2 %v755_v43 }
 0x221   :  { %v772_v45 = vpop.permute.xlu1 %771 }
 0x222   :  { %v774_v49 = vsel %vm108_vm9, %v770_v29, %v772_v45 }
 0x223   :  { %v570_v50 = vpop.permute.xlu0 %569  ;;  %1092 = vmatpush.msk.msrb.mxu3 %vm1395_vm3, %v774_v49 }
 0x224   :  { %v573_v16 = vsel %vm68_vm11, %v1189_v48, %v570_v50 }
 0x225   :  { %1075 = vmatpush.msk.msrb.mxu0 %vm1411_vm5, %v573_v16  ;;  %1003 = vmatpush.msrb.mxu3 %v756_v5 }
 0x226   :  { %1040 = vmatmul.msk.f32.vlgmr.msrb.gmra.mxu0 %vm432_vm12, %v883_v33 }
 0x229   :  { %v732_v52 = vpop.permute.xlu1 %731 }
 0x22a   :  { %v735_v34 = vsel %vm68_vm11, %v1188_v51, %v732_v52  ;;  %v736_v53 = vsel %vm68_vm11, %v732_v52, %v734_v25 }
 0x22b   :  { %1087 = vmatpush.msk.msrb.mxu2 %vm1411_vm5, %v735_v34  ;;  %1093 = vmatpush.msk.msrb.mxu3 %vm1415_vm6, %v736_v53 }
 0x22c   :  { %1042 = vmatmul.msk.f32.vlgmr.msrb.gmra.mxu2 %vm432_vm12, %v883_v33  ;;  %1043 = vmatmul.msk.f32.vlgmr.msrb.gmra.mxu3 %vm432_vm12, %v883_v33 }
 0x231   :  { %v572_v54 = vpop.permute.xlu1 %571 }
 0x232   :  { %v574_v55 = vsel %vm68_vm11, %v570_v50, %v572_v54 }
 0x233   :  { %1081 = vmatpush.msk.msrb.mxu1 %vm1415_vm6, %v574_v55 }
 0x234   :  { %1041 = vmatmul.msk.f32.vlgmr.msrb.gmra.mxu1 %vm432_vm12, %v883_v33 }
 0x26e   :  { %v549_v57 = vpop.permute.xlu0 %548 }
 0x26f   :  { %v551_v59 = vadd.f32 %v549_v57, %v459_v30  ;;  %v553_v7 = vadd.f32 %v549_v57, %v505_v60  ;;  %v554_v10 = vadd.f32 %v549_v57, %v528_v61  ;;  %v552_v17 = vadd.f32 %v549_v57, %v482_v63 }
 0x2a3   :  { %v946_v46 = vpop.f32.mrf.mxu0 }
 0x2a4   :  { %v947_v58 = vadd.f32 %v946_v46, %v924_v56 }
 0x2a6   :  { %v1009_v62 = vmax.f32 %v947_v58, 0.0 }
 0x2a8   :  { %v1013_v0 = vadd.f32 %v1009_v62, %v551_v59 }
 0x2aa   :  { %v1017_v2 = vmax.f32 %v1013_v0, 0.0 }
 0x2ac   :  { %1021 = vst [vmem:[%s1741_s7] sm:$0xff] %v1017_v2 }
 0x2af   :  { %v986_v47 = vpop.f32.mrf.mxu2  ;;  %v1006_v3 = vpop.f32.mrf.mxu3 }
 0x2b0   :  { %v987_v4 = vadd.f32 %v986_v47, %v924_v56  ;;  %v1007_v6 = vadd.f32 %v1006_v3, %v924_v56 }
 0x2b1   :  { %v966_v8 = vpop.f32.mrf.mxu1 }
 0x2b2   :  { %v1011_v11 = vmax.f32 %v987_v4, 0.0  ;;  %v1012_v12 = vmax.f32 %v1007_v6, 0.0  ;;  %v967_v13 = vadd.f32 %v966_v8, %v924_v56 }
 0x2b4   :  { %v1015_v21 = vadd.f32 %v1011_v11, %v553_v7  ;;  %v1016_v18 = vadd.f32 %v1012_v12, %v554_v10  ;;  %v1010_v23 = vmax.f32 %v967_v13, 0.0 }
 0x2b6   :  { %v1019_v25 = vmax.f32 %v1015_v21, 0.0  ;;  %v1020_v24 = vmax.f32 %v1016_v18, 0.0  ;;  %v1014_v26 = vadd.f32 %v1010_v23, %v552_v17 }
 0x2b8   :  { %1044 = vst [vmem:[%s1741_s7 + $0x10] sm:$0xff] %v1019_v25  ;;  %v1018_v20 = vmax.f32 %v1014_v26, 0.0 }
 0x2b9   :  { %1045 = vst [vmem:[%s1741_s7 + $0x18] sm:$0xff] %v1020_v24 }
 0x2ba   :  { %1022 = vst [vmem:[%s1741_s7 + $0x8] sm:$0xff] %v1018_v20 }

</bundles_post_ra>
